<compile_context>
chip_gen: v6e
topology: v6e:2x2x1
jax: 0.10.0
libtpu: 0.0.40
codegen_flags: <defaults>
</compile_context>

<pallas_src>
import functools

import jax
import jax.numpy as jnp
import numpy as np
from jax.experimental import pallas as pl
from jax.experimental.pallas import tpu as pltpu

_EPS = 1e-5


def _build_tap_masks(H, W):
    """(9, H*W) f32 validity masks for the 9 taps of a 3x3 'same' convolution."""
    m = np.zeros((9, H, W), np.float32)
    for k in range(9):
        oy, ox = k // 3 - 1, k % 3 - 1
        m[k, max(0, -oy):H - max(0, oy), max(0, -ox):W - max(0, ox)] = 1.0
    return m.reshape(9, H * W)


def _choose_nb(N, Cin, C1, Cout, HW):
    """Images per grid step.

    Target a few-MiB per-step working set (amortizes per-step overhead, long MXU lane
    extents, large lane-dense DMAs) while (a) keeping the grid length >= 2 so the
    'parallel' axis can feed both v7x TensorCores and (b) staying far under the scoped
    VMEM defaults (16 MiB on v5e, 32 MiB on v6e/v7x; 64 MiB physical per TC on v7x).
    """
    per_img = (2 * Cin * HW * 4                 # x block, double-buffered
               + 2 * C1 * HW * 2                # y1 block (bf16), double-buffered
               + 2 * Cout * HW * 4              # residual block, double-buffered
               + Cout * HW * 4                  # output block
               + 9 * max(Cin, C1) * HW * 2)     # bf16 patch scratch
    target = 4 << 20
    nb = int(max(1, min(N, target // max(per_img, 1))))
    while nb > 1 and N // nb < 2:               # keep >= 2 grid steps (v7x megacore)
        nb -= 1
    while N % nb:                               # blocks must tile N evenly
        nb -= 1
    return nb


# ------------------------------- kernel helpers --------------------------------
def _zero_halos(pad_ref, *, width, hw):
    """Zero only the halo lanes a conv tap can read.

    Done once per grid step (the central region is fully overwritten for every image);
    NOT guarded by pl.when(program_id==0), because under megacore each TensorCore has
    its own scratch and may start at a nonzero program id.
    """
    C = pad_ref.shape[0]
    halo = width + 1
    pad_left = pad_ref.shape[1] - hw - halo
    pad_ref[:, pad_left - halo:pad_left] = jnp.zeros((C, halo), jnp.float32)
    pad_ref[:, pad_left + hw:] = jnp.zeros((C, halo), jnp.float32)


def _fill_patch(a, mask_ref, pad_ref, pat_ref, img, *, width, hw):
    """Write the 9 taps of image `img` (a: (C, HW) f32) into the bf16 patch matrix.

    Taps are lane-shifted reads of a row-padded staging copy of `a` (zeroed halo covers
    vertical out-of-range reads).  Only taps with a horizontal offset need the border
    mask (row wrap-around); the three ox==0 taps skip the mask multiply entirely.
    Each tap is cast to bf16 at store time so the MXU operand never needs a bulk
    f32->bf16 repack.
    """
    C = a.shape[0]
    halo = width + 1
    pad_left = pad_ref.shape[1] - hw - halo      # multiple of 128 -> aligned store
    pad_ref[:, pad_left:pad_left + hw] = a
    col = img * hw
    for k in range(9):
        oy, ox = k // 3 - 1, k % 3 - 1
        if oy == 0 and ox == 0:
            tap = a                              # centre tap: no shift, no mask
        else:
            off = pad_left + oy * width + ox
            tap = pad_ref[:, off:off + hw]
            if ox != 0:                          # only horizontal shifts wrap rows
                tap = tap * mask_ref[k:k + 1, :]
        pat_ref[k * C:(k + 1) * C, col:col + hw] = tap.astype(pat_ref.dtype)


# ------------------------------- kernel bodies ---------------------------------
def _bn_stats_kernel(x_ref, sum_ref, sq_ref):
    """Per-block partial (sum, sum-of-squares) over this grid step's images."""
    C = x_ref.shape[1]
    s = jnp.zeros((C, 1), jnp.float32)
    q = jnp.zeros((C, 1), jnp.float32)
    for i in range(x_ref.shape[0]):
        xi = x_ref[i]                                       # (C, HW) f32
        s = s + jnp.sum(xi, axis=1, keepdims=True)
        q = q + jnp.sum(xi * xi, axis=1, keepdims=True)
    sum_ref[0] = s
    sq_ref[0] = q


def _conv1_kernel(x_ref, sc_ref, sh_ref, w_ref, b_ref, mask_ref,
                  y_ref, sum_ref, sq_ref, pad_ref, pat_ref, *, width, hw):
    """BN1-apply + ReLU + conv1 for a block of nb images; emits BN2 partial stats.

    All nb images are packed into one (9*Cin, nb*HW) bf16 patch so the conv is a
    single MXU matmul with a long lane dimension.  Stats are taken from the f32
    accumulator; the y1 intermediate is written to HBM in bf16.
    """
    nb = x_ref.shape[0]
    _zero_halos(pad_ref, width=width, hw=hw)
    for i in range(nb):
        a = jnp.maximum(x_ref[i] * sc_ref[...] + sh_ref[...], 0.0)
        _fill_patch(a, mask_ref, pad_ref, pat_ref, i, width=width, hw=hw)
    y = jnp.dot(w_ref[...], pat_ref[...],
                preferred_element_type=jnp.float32) + b_ref[...]     # (C1, nb*HW) f32
    sum_ref[0] = jnp.sum(y, axis=1, keepdims=True)
    sq_ref[0] = jnp.sum(y * y, axis=1, keepdims=True)
    for i in range(nb):
        y_ref[i] = y[:, i * hw:(i + 1) * hw].astype(y_ref.dtype)


def _conv2_kernel(y1_ref, res_ref, sc_ref, sh_ref, w_ref, b_ref, mask_ref,
                  out_ref, pad_ref, pat_ref, *, width, hw):
    """BN2-apply + ReLU + conv2 + residual add for a block of nb images."""
    nb = y1_ref.shape[0]
    _zero_halos(pad_ref, width=width, hw=hw)
    for i in range(nb):
        a = jnp.maximum(y1_ref[i].astype(jnp.float32) * sc_ref[...] + sh_ref[...], 0.0)
        _fill_patch(a, mask_ref, pad_ref, pat_ref, i, width=width, hw=hw)
    o = jnp.dot(w_ref[...], pat_ref[...],
                preferred_element_type=jnp.float32) + b_ref[...]     # (Cout, nb*HW)
    for i in range(nb):
        out_ref[i] = (o[:, i * hw:(i + 1) * hw] + res_ref[i]).astype(out_ref.dtype)


# ---------------------------------- wrapper -------------------------------------
def pre_activation_block(x_nchw, params):
    """Forward of PreActivationBlock (training-mode BN, stride=1, no downsample).

    x_nchw: (N, Cin, H, W) float32.  Returns (N, Cout, H, W) float32.
    """
    N, Cin, H, W = x_nchw.shape
    HW = H * W
    w1, w2 = params["conv1_w"], params["conv2_w"]
    C1, Cout = w1.shape[0], w2.shape[0]
    if Cout != Cin:
        raise ValueError("residual add requires out_channels == in_channels "
                         "(downsample=None)")

    # Channels-first slab: long spatial axis on lanes, reshape only (no transpose).
    x = x_nchw.reshape(N, Cin, HW).astype(jnp.float32)
    cnt = jnp.float32(N * HW)

    nb = _choose_nb(N, Cin, C1, Cout, HW)
    nblk = N // nb

    # Conv weights OIHW -> (Cout, 9*Cin), tap-major (ky*3+kx) then ci; bf16 for the MXU.
    w1cat = jnp.transpose(w1, (0, 2, 3, 1)).reshape(C1, 9 * Cin).astype(jnp.bfloat16)
    w2cat = jnp.transpose(w2, (0, 2, 3, 1)).reshape(Cout, 9 * C1).astype(jnp.bfloat16)
    b1 = params["conv1_b"].reshape(C1, 1).astype(jnp.float32)
    b2 = params["conv2_b"].reshape(Cout, 1).astype(jnp.float32)
    tapmask = jnp.asarray(_build_tap_masks(H, W))            # (9, HW) f32 constants

    halo = W + 1
    pad_left = -(-halo // 128) * 128                         # 128-aligned left halo
    padded = pad_left + HW + halo

    # Only raise the scoped-VMEM limit when the chosen block actually needs it
    # (keeps the conservative per-generation defaults for small problems).
    step_bytes = (nb * (2 * Cin * HW * 4 + 2 * C1 * HW * 2 + 3 * Cout * HW * 4)
                  + 9 * max(Cin, C1) * nb * HW * 2 + max(Cin, C1) * padded * 4)
    vmem_limit = (32 << 20) if step_bytes > (12 << 20) else None
    parallel = pltpu.CompilerParams(dimension_semantics=("parallel",),
                                    vmem_limit_bytes=vmem_limit)

    # ---- pass 1: BN1 batch statistics (per-block partials, reduced in JAX) ----
    sum1, sq1 = pl.pallas_call(
        _bn_stats_kernel,
        out_shape=(jax.ShapeDtypeStruct((nblk, Cin, 1), jnp.float32),
                   jax.ShapeDtypeStruct((nblk, Cin, 1), jnp.float32)),
        grid=(nblk,),
        in_specs=[pl.BlockSpec((nb, Cin, HW), lambda n: (n, 0, 0))],
        out_specs=(pl.BlockSpec((1, Cin, 1), lambda n: (n, 0, 0)),
                   pl.BlockSpec((1, Cin, 1), lambda n: (n, 0, 0))),
        compiler_params=parallel,
    )(x)

    mean1 = jnp.sum(sum1, axis=0)[:, 0] / cnt
    var1 = jnp.maximum(jnp.sum(sq1, axis=0)[:, 0] / cnt - mean1 * mean1, 0.0)
    scale1 = params["bn1_g"] * jax.lax.rsqrt(var1 + _EPS)
    shift1 = params["bn1_b"] - mean1 * scale1

    # ---- pass 2: BN1-apply + ReLU + conv1, fused BN2 partial stats, bf16 y1 ----
    y1, y1_sum, y1_sq = pl.pallas_call(
        functools.partial(_conv1_kernel, width=W, hw=HW),
        out_shape=(jax.ShapeDtypeStruct((N, C1, HW), jnp.bfloat16),
                   jax.ShapeDtypeStruct((nblk, C1, 1), jnp.float32),
                   jax.ShapeDtypeStruct((nblk, C1, 1), jnp.float32)),
        grid=(nblk,),
        in_specs=[
            pl.BlockSpec((nb, Cin, HW), lambda n: (n, 0, 0)),   # x
            pl.BlockSpec((Cin, 1), lambda n: (0, 0)),           # BN1 scale
            pl.BlockSpec((Cin, 1), lambda n: (0, 0)),           # BN1 shift
            pl.BlockSpec((C1, 9 * Cin), lambda n: (0, 0)),      # conv1 weight (bf16)
            pl.BlockSpec((C1, 1), lambda n: (0, 0)),            # conv1 bias
            pl.BlockSpec((9, HW), lambda n: (0, 0)),            # tap border masks
        ],
        out_specs=(pl.BlockSpec((nb, C1, HW), lambda n: (n, 0, 0)),
                   pl.BlockSpec((1, C1, 1), lambda n: (n, 0, 0)),
                   pl.BlockSpec((1, C1, 1), lambda n: (n, 0, 0))),
        scratch_shapes=[pltpu.VMEM((Cin, padded), jnp.float32),        # row-padded stage
                        pltpu.VMEM((9 * Cin, nb * HW), jnp.bfloat16)],  # bf16 patches
        compiler_params=parallel,
    )(x, scale1.reshape(Cin, 1), shift1.reshape(Cin, 1), w1cat, b1, tapmask)

    mean2 = jnp.sum(y1_sum, axis=0)[:, 0] / cnt
    var2 = jnp.maximum(jnp.sum(y1_sq, axis=0)[:, 0] / cnt - mean2 * mean2, 0.0)
    scale2 = params["bn2_g"] * jax.lax.rsqrt(var2 + _EPS)
    shift2 = params["bn2_b"] - mean2 * scale2

    # ---- pass 3: BN2-apply + ReLU + conv2 + residual (x's HBM buffer reused) ----
    out = pl.pallas_call(
        functools.partial(_conv2_kernel, width=W, hw=HW),
        out_shape=jax.ShapeDtypeStruct((N, Cout, HW), jnp.float32),
        grid=(nblk,),
        in_specs=[
            pl.BlockSpec((nb, C1, HW), lambda n: (n, 0, 0)),    # y1 (bf16)
            pl.BlockSpec((nb, Cout, HW), lambda n: (n, 0, 0)),  # residual x
            pl.BlockSpec((C1, 1), lambda n: (0, 0)),            # BN2 scale
            pl.BlockSpec((C1, 1), lambda n: (0, 0)),            # BN2 shift
            pl.BlockSpec((Cout, 9 * C1), lambda n: (0, 0)),     # conv2 weight (bf16)
            pl.BlockSpec((Cout, 1), lambda n: (0, 0)),          # conv2 bias
            pl.BlockSpec((9, HW), lambda n: (0, 0)),            # tap border masks
        ],
        out_specs=pl.BlockSpec((nb, Cout, HW), lambda n: (n, 0, 0)),
        scratch_shapes=[pltpu.VMEM((C1, padded), jnp.float32),
                        pltpu.VMEM((9 * C1, nb * HW), jnp.bfloat16)],
        compiler_params=parallel,
        input_output_aliases={1: 0},     # residual & output use identical index maps
    )(y1, x, scale2.reshape(C1, 1), shift2.reshape(C1, 1), w2cat, b2, tapmask)

    return out.reshape(N, Cout, H, W)


# ----------------------------- pure-JAX reference --------------------------------
def _reference_forward(x, params):
    def bn(v, g, b):
        mean = jnp.mean(v, axis=(0, 2, 3), keepdims=True)
        var = jnp.mean((v - mean) ** 2, axis=(0, 2, 3), keepdims=True)
        return (v - mean) * jax.lax.rsqrt(var + _EPS) * g.reshape(1, -1, 1, 1) \
            + b.reshape(1, -1, 1, 1)

    def conv(v, w, b):
        y = jax.lax.conv_general_dilated(
            v, w, window_strides=(1, 1), padding=((1, 1), (1, 1)),
            dimension_numbers=("NCHW", "OIHW", "NCHW"))
        return y + b.reshape(1, -1, 1, 1)

    out = jnp.maximum(bn(x, params["bn1_g"], params["bn1_b"]), 0.0)
    out = conv(out, params["conv1_w"], params["conv1_b"])
    out = jnp.maximum(bn(out, params["bn2_g"], params["bn2_b"]), 0.0)
    out = conv(out, params["conv2_w"], params["conv2_b"])
    return out + x


if __name__ == "__main__":
    # Small shapes consistent with the module; the residual add with downsample=None
    # forces out_channels == in_channels.
    N, Cin, H, W = 2, 4, 16, 16
    Cblk = 8            # block_channels_1 == block_channels_2
    Cout = Cin

    key = jax.random.PRNGKey(0)
    k = jax.random.split(key, 9)
    params = {
        "bn1_g": jax.random.normal(k[0], (Cin,), jnp.float32) * 0.2 + 1.0,
        "bn1_b": jax.random.normal(k[1], (Cin,), jnp.float32) * 0.1,
        "conv1_w": jax.random.normal(k[2], (Cblk, Cin, 3, 3), jnp.float32) * 0.1,
        "conv1_b": jax.random.normal(k[3], (Cblk,), jnp.float32) * 0.05,
        "bn2_g": jax.random.normal(k[4], (Cblk,), jnp.float32) * 0.2 + 1.0,
        "bn2_b": jax.random.normal(k[5], (Cblk,), jnp.float32) * 0.1,
        "conv2_w": jax.random.normal(k[6], (Cout, Cblk, 3, 3), jnp.float32) * 0.1,
        "conv2_b": jax.random.normal(k[7], (Cout,), jnp.float32) * 0.05,
    }
    x = jax.random.normal(k[8], (N, Cin, H, W), jnp.float32)

    out = jax.block_until_ready(jax.jit(pre_activation_block)(x, params))
    ref = jax.block_until_ready(_reference_forward(x, params))

    # bf16 MXU operands, bf16 y1 intermediate and one-pass batch variance -> compare
    # against the exact f32 reference with a correspondingly loosened tolerance.
    np.testing.assert_allclose(np.asarray(out), np.asarray(ref), rtol=2e-2, atol=6e-2)
    print("KERNEL_OK")
</pallas_src>

<mosaic_0001>
module attributes {stable_mosaic.version = 11 : i64} {
  func.func @_bn_stats_kernel(%arg0: i32, %arg1: memref<1x4x256xf32, #tpu.memory_space<vmem>>, %arg2: memref<1x4x1xf32, #tpu.memory_space<vmem>>, %arg3: memref<1x4x1xf32, #tpu.memory_space<vmem>>) attributes {dimension_semantics = [#tpu.dimension_semantics<parallel>], iteration_bounds = array<i64: 2>, scalar_prefetch = 0 : i64, scratch_operands = 0 : i64, tpu.core_type = #tpu.core_type<tc>, window_params = [{transform_indices = @transform_0, window_bounds = array<i64: 1, 4, 256>}, {transform_indices = @transform_1, window_bounds = array<i64: 1, 4, 1>}, {transform_indices = @transform_2, window_bounds = array<i64: 1, 4, 1>}]} {
    %cst = arith.constant 0.000000e+00 : f32
    %0 = vector.broadcast %cst : f32 to vector<4x1xf32>
    %cst_0 = arith.constant 0.000000e+00 : f32
    %1 = vector.broadcast %cst_0 : f32 to vector<4x1xf32>
    %c0 = arith.constant 0 : index
    %c0_1 = arith.constant 0 : index
    %c0_2 = arith.constant 0 : index
    %2 = vector.load %arg1[%c0, %c0_1, %c0_2] : memref<1x4x256xf32, #tpu.memory_space<vmem>>, vector<1x4x256xf32>
    %3 = vector.shape_cast %2 : vector<1x4x256xf32> to vector<4x256xf32>
    %cst_3 = arith.constant dense<0.000000e+00> : vector<4xf32>
    %4 = vector.multi_reduction <add>, %3, %cst_3 [1] : vector<4x256xf32> to vector<4xf32>
    %5 = vector.shape_cast %4 : vector<4xf32> to vector<4x1xf32>
    %6 = arith.addf %0, %5 : vector<4x1xf32>
    %7 = arith.mulf %3, %3 : vector<4x256xf32>
    %cst_4 = arith.constant dense<0.000000e+00> : vector<4xf32>
    %8 = vector.multi_reduction <add>, %7, %cst_4 [1] : vector<4x256xf32> to vector<4xf32>
    %9 = vector.shape_cast %8 : vector<4xf32> to vector<4x1xf32>
    %10 = arith.addf %1, %9 : vector<4x1xf32>
    %c0_5 = arith.constant 0 : index
    %c0_6 = arith.constant 0 : index
    %c0_7 = arith.constant 0 : index
    %11 = vector.load %arg2[%c0_5, %c0_6, %c0_7] : memref<1x4x1xf32, #tpu.memory_space<vmem>>, vector<1x4x1xf32>
    %12 = vector.shape_cast %11 : vector<1x4x1xf32> to vector<4x1xf32>
    %13 = vector.shape_cast %6 : vector<4x1xf32> to vector<1x4x1xf32>
    tpu.vector_store %arg2[%c0_5, %c0_6, %c0_7], %13 {strides = array<i32>} : memref<1x4x1xf32, #tpu.memory_space<vmem>>, vector<1x4x1xf32>,
    %c0_8 = arith.constant 0 : index
    %c0_9 = arith.constant 0 : index
    %c0_10 = arith.constant 0 : index
    %14 = vector.load %arg3[%c0_8, %c0_9, %c0_10] : memref<1x4x1xf32, #tpu.memory_space<vmem>>, vector<1x4x1xf32>
    %15 = vector.shape_cast %14 : vector<1x4x1xf32> to vector<4x1xf32>
    %16 = vector.shape_cast %10 : vector<4x1xf32> to vector<1x4x1xf32>
    tpu.vector_store %arg3[%c0_8, %c0_9, %c0_10], %16 {strides = array<i32>} : memref<1x4x1xf32, #tpu.memory_space<vmem>>, vector<1x4x1xf32>,
    return
  }
  func.func @transform_0(%arg0: i32) -> (i32, i32, i32) {
    %c0_i32 = arith.constant 0 : i32
    %c0_i32_0 = arith.constant 0 : i32
    %c0_i32_1 = arith.constant 0 : i32
    return %arg0, %c0_i32, %c0_i32_0 : i32, i32, i32
  }
  func.func @transform_1(%arg0: i32) -> (i32, i32, i32) {
    %c0_i32 = arith.constant 0 : i32
    %c0_i32_0 = arith.constant 0 : i32
    %c0_i32_1 = arith.constant 0 : i32
    return %arg0, %c0_i32, %c0_i32_0 : i32, i32, i32
  }
  func.func @transform_2(%arg0: i32) -> (i32, i32, i32) {
    %c0_i32 = arith.constant 0 : i32
    %c0_i32_0 = arith.constant 0 : i32
    %c0_i32_1 = arith.constant 0 : i32
    return %arg0, %c0_i32, %c0_i32_0 : i32, i32, i32
  }
}

module attributes {stable_mosaic.version = 11 : i64} {
  func.func @_conv1_kernel(%arg0: i32, %arg1: memref<1x4x256xf32, #tpu.memory_space<vmem>>, %arg2: memref<4x1xf32, #tpu.memory_space<vmem>>, %arg3: memref<4x1xf32, #tpu.memory_space<vmem>>, %arg4: memref<8x36xbf16, #tpu.memory_space<vmem>>, %arg5: memref<8x1xf32, #tpu.memory_space<vmem>>, %arg6: memref<9x256xf32, #tpu.memory_space<vmem>>, %arg7: memref<1x8x256xbf16, #tpu.memory_space<vmem>>, %arg8: memref<1x8x1xf32, #tpu.memory_space<vmem>>, %arg9: memref<1x8x1xf32, #tpu.memory_space<vmem>>, %arg10: memref<4x401xf32, #tpu.memory_space<vmem>>, %arg11: memref<36x256xbf16, #tpu.memory_space<vmem>>) attributes {dimension_semantics = [#tpu.dimension_semantics<parallel>], iteration_bounds = array<i64: 2>, scalar_prefetch = 0 : i64, scratch_operands = 2 : i64, tpu.core_type = #tpu.core_type<tc>, window_params = [{transform_indices = @transform_0, window_bounds = array<i64: 1, 4, 256>}, {pipeline_mode = #tpu.pipeline_mode<synchronous>, transform_indices = @transform_1, window_bounds = array<i64: 4, 1>}, {pipeline_mode = #tpu.pipeline_mode<synchronous>, transform_indices = @transform_2, window_bounds = array<i64: 4, 1>}, {pipeline_mode = #tpu.pipeline_mode<synchronous>, transform_indices = @transform_3, window_bounds = array<i64: 8, 36>}, {pipeline_mode = #tpu.pipeline_mode<synchronous>, transform_indices = @transform_4, window_bounds = array<i64: 8, 1>}, {pipeline_mode = #tpu.pipeline_mode<synchronous>, transform_indices = @transform_5, window_bounds = array<i64: 9, 256>}, {transform_indices = @transform_6, window_bounds = array<i64: 1, 8, 256>}, {transform_indices = @transform_7, window_bounds = array<i64: 1, 8, 1>}, {transform_indices = @transform_8, window_bounds = array<i64: 1, 8, 1>}]} {
    %cst = arith.constant 0.000000e+00 : f32
    %0 = vector.broadcast %cst : f32 to vector<4x17xf32>
    %c0 = arith.constant 0 : index
    %c111 = arith.constant 111 : index
    %1 = vector.load %arg10[%c0, %c111] : memref<4x401xf32, #tpu.memory_space<vmem>>, vector<4x17xf32>
    tpu.vector_store %arg10[%c0, %c111], %0 {strides = array<i32>} : memref<4x401xf32, #tpu.memory_space<vmem>>, vector<4x17xf32>,
    %cst_0 = arith.constant 0.000000e+00 : f32
    %2 = vector.broadcast %cst_0 : f32 to vector<4x17xf32>
    %c0_1 = arith.constant 0 : index
    %c384 = arith.constant 384 : index
    %3 = vector.load %arg10[%c0_1, %c384] : memref<4x401xf32, #tpu.memory_space<vmem>>, vector<4x17xf32>
    tpu.vector_store %arg10[%c0_1, %c384], %2 {strides = array<i32>} : memref<4x401xf32, #tpu.memory_space<vmem>>, vector<4x17xf32>,
    %c0_2 = arith.constant 0 : index
    %c0_3 = arith.constant 0 : index
    %c0_4 = arith.constant 0 : index
    %4 = vector.load %arg1[%c0_2, %c0_3, %c0_4] : memref<1x4x256xf32, #tpu.memory_space<vmem>>, vector<1x4x256xf32>
    %5 = vector.shape_cast %4 : vector<1x4x256xf32> to vector<4x256xf32>
    %c0_5 = arith.constant 0 : index
    %c0_6 = arith.constant 0 : index
    %6 = vector.load %arg2[%c0_5, %c0_6] : memref<4x1xf32, #tpu.memory_space<vmem>>, vector<4x1xf32>
    %7 = vector.broadcast %6 : vector<4x1xf32> to vector<4x256xf32>
    %8 = arith.mulf %5, %7 : vector<4x256xf32>
    %c0_7 = arith.constant 0 : index
    %c0_8 = arith.constant 0 : index
    %9 = vector.load %arg3[%c0_7, %c0_8] : memref<4x1xf32, #tpu.memory_space<vmem>>, vector<4x1xf32>
    %10 = vector.broadcast %9 : vector<4x1xf32> to vector<4x256xf32>
    %11 = arith.addf %8, %10 : vector<4x256xf32>
    %cst_9 = arith.constant 0.000000e+00 : f32
    %12 = vector.broadcast %cst_9 : f32 to vector<4x256xf32>
    %13 = arith.maximumf %11, %12 : vector<4x256xf32>
    %c0_10 = arith.constant 0 : index
    %c128 = arith.constant 128 : index
    %14 = vector.load %arg10[%c0_10, %c128] : memref<4x401xf32, #tpu.memory_space<vmem>>, vector<4x256xf32>
    tpu.vector_store %arg10[%c0_10, %c128], %13 {strides = array<i32>} : memref<4x401xf32, #tpu.memory_space<vmem>>, vector<4x256xf32>,
    %c0_11 = arith.constant 0 : index
    %c111_12 = arith.constant 111 : index
    %15 = vector.load %arg10[%c0_11, %c111_12] : memref<4x401xf32, #tpu.memory_space<vmem>>, vector<4x256xf32>
    %c0_13 = arith.constant 0 : index
    %c0_14 = arith.constant 0 : index
    %16 = vector.load %arg6[%c0_13, %c0_14] : memref<9x256xf32, #tpu.memory_space<vmem>>, vector<1x256xf32>
    %17 = vector.broadcast %16 : vector<1x256xf32> to vector<4x256xf32>
    %18 = arith.mulf %15, %17 : vector<4x256xf32>
    %19 = arith.truncf %18 : vector<4x256xf32> to vector<4x256xbf16>
    %c0_15 = arith.constant 0 : index
    %c0_16 = arith.constant 0 : index
    %20 = vector.load %arg11[%c0_15, %c0_16] : memref<36x256xbf16, #tpu.memory_space<vmem>>, vector<4x256xbf16>
    tpu.vector_store %arg11[%c0_15, %c0_16], %19 {strides = array<i32>} : memref<36x256xbf16, #tpu.memory_space<vmem>>, vector<4x256xbf16>,
    %c0_17 = arith.constant 0 : index
    %c112 = arith.constant 112 : index
    %21 = vector.load %arg10[%c0_17, %c112] : memref<4x401xf32, #tpu.memory_space<vmem>>, vector<4x256xf32>
    %22 = arith.truncf %21 : vector<4x256xf32> to vector<4x256xbf16>
    %c4 = arith.constant 4 : index
    %c0_18 = arith.constant 0 : index
    %23 = vector.load %arg11[%c4, %c0_18] : memref<36x256xbf16, #tpu.memory_space<vmem>>, vector<4x256xbf16>
    tpu.vector_store %arg11[%c4, %c0_18], %22 {strides = array<i32>} : memref<36x256xbf16, #tpu.memory_space<vmem>>, vector<4x256xbf16>,
    %c0_19 = arith.constant 0 : index
    %c113 = arith.constant 113 : index
    %24 = vector.load %arg10[%c0_19, %c113] : memref<4x401xf32, #tpu.memory_space<vmem>>, vector<4x256xf32>
    %c2 = arith.constant 2 : index
    %c0_20 = arith.constant 0 : index
    %25 = vector.load %arg6[%c2, %c0_20] : memref<9x256xf32, #tpu.memory_space<vmem>>, vector<1x256xf32>
    %26 = vector.broadcast %25 : vector<1x256xf32> to vector<4x256xf32>
    %27 = arith.mulf %24, %26 : vector<4x256xf32>
    %28 = arith.truncf %27 : vector<4x256xf32> to vector<4x256xbf16>
    %c8 = arith.constant 8 : index
    %c0_21 = arith.constant 0 : index
    %29 = vector.load %arg11[%c8, %c0_21] : memref<36x256xbf16, #tpu.memory_space<vmem>>, vector<4x256xbf16>
    tpu.vector_store %arg11[%c8, %c0_21], %28 {strides = array<i32>} : memref<36x256xbf16, #tpu.memory_space<vmem>>, vector<4x256xbf16>,
    %c0_22 = arith.constant 0 : index
    %c127 = arith.constant 127 : index
    %30 = vector.load %arg10[%c0_22, %c127] : memref<4x401xf32, #tpu.memory_space<vmem>>, vector<4x256xf32>
    %c3 = arith.constant 3 : index
    %c0_23 = arith.constant 0 : index
    %31 = vector.load %arg6[%c3, %c0_23] : memref<9x256xf32, #tpu.memory_space<vmem>>, vector<1x256xf32>
    %32 = vector.broadcast %31 : vector<1x256xf32> to vector<4x256xf32>
    %33 = arith.mulf %30, %32 : vector<4x256xf32>
    %34 = arith.truncf %33 : vector<4x256xf32> to vector<4x256xbf16>
    %c12 = arith.constant 12 : index
    %c0_24 = arith.constant 0 : index
    %35 = vector.load %arg11[%c12, %c0_24] : memref<36x256xbf16, #tpu.memory_space<vmem>>, vector<4x256xbf16>
    tpu.vector_store %arg11[%c12, %c0_24], %34 {strides = array<i32>} : memref<36x256xbf16, #tpu.memory_space<vmem>>, vector<4x256xbf16>,
    %36 = arith.truncf %13 : vector<4x256xf32> to vector<4x256xbf16>
    %c16 = arith.constant 16 : index
    %c0_25 = arith.constant 0 : index
    %37 = vector.load %arg11[%c16, %c0_25] : memref<36x256xbf16, #tpu.memory_space<vmem>>, vector<4x256xbf16>
    tpu.vector_store %arg11[%c16, %c0_25], %36 {strides = array<i32>} : memref<36x256xbf16, #tpu.memory_space<vmem>>, vector<4x256xbf16>,
    %c0_26 = arith.constant 0 : index
    %c129 = arith.constant 129 : index
    %38 = vector.load %arg10[%c0_26, %c129] : memref<4x401xf32, #tpu.memory_space<vmem>>, vector<4x256xf32>
    %c5 = arith.constant 5 : index
    %c0_27 = arith.constant 0 : index
    %39 = vector.load %arg6[%c5, %c0_27] : memref<9x256xf32, #tpu.memory_space<vmem>>, vector<1x256xf32>
    %40 = vector.broadcast %39 : vector<1x256xf32> to vector<4x256xf32>
    %41 = arith.mulf %38, %40 : vector<4x256xf32>
    %42 = arith.truncf %41 : vector<4x256xf32> to vector<4x256xbf16>
    %c20 = arith.constant 20 : index
    %c0_28 = arith.constant 0 : index
    %43 = vector.load %arg11[%c20, %c0_28] : memref<36x256xbf16, #tpu.memory_space<vmem>>, vector<4x256xbf16>
    tpu.vector_store %arg11[%c20, %c0_28], %42 {strides = array<i32>} : memref<36x256xbf16, #tpu.memory_space<vmem>>, vector<4x256xbf16>,
    %c0_29 = arith.constant 0 : index
    %c143 = arith.constant 143 : index
    %44 = vector.load %arg10[%c0_29, %c143] : memref<4x401xf32, #tpu.memory_space<vmem>>, vector<4x256xf32>
    %c6 = arith.constant 6 : index
    %c0_30 = arith.constant 0 : index
    %45 = vector.load %arg6[%c6, %c0_30] : memref<9x256xf32, #tpu.memory_space<vmem>>, vector<1x256xf32>
    %46 = vector.broadcast %45 : vector<1x256xf32> to vector<4x256xf32>
    %47 = arith.mulf %44, %46 : vector<4x256xf32>
    %48 = arith.truncf %47 : vector<4x256xf32> to vector<4x256xbf16>
    %c24 = arith.constant 24 : index
    %c0_31 = arith.constant 0 : index
    %49 = vector.load %arg11[%c24, %c0_31] : memref<36x256xbf16, #tpu.memory_space<vmem>>, vector<4x256xbf16>
    tpu.vector_store %arg11[%c24, %c0_31], %48 {strides = array<i32>} : memref<36x256xbf16, #tpu.memory_space<vmem>>, vector<4x256xbf16>,
    %c0_32 = arith.constant 0 : index
    %c144 = arith.constant 144 : index
    %50 = vector.load %arg10[%c0_32, %c144] : memref<4x401xf32, #tpu.memory_space<vmem>>, vector<4x256xf32>
    %51 = arith.truncf %50 : vector<4x256xf32> to vector<4x256xbf16>
    %c28 = arith.constant 28 : index
    %c0_33 = arith.constant 0 : index
    %52 = vector.load %arg11[%c28, %c0_33] : memref<36x256xbf16, #tpu.memory_space<vmem>>, vector<4x256xbf16>
    tpu.vector_store %arg11[%c28, %c0_33], %51 {strides = array<i32>} : memref<36x256xbf16, #tpu.memory_space<vmem>>, vector<4x256xbf16>,
    %c0_34 = arith.constant 0 : index
    %c145 = arith.constant 145 : index
    %53 = vector.load %arg10[%c0_34, %c145] : memref<4x401xf32, #tpu.memory_space<vmem>>, vector<4x256xf32>
    %c8_35 = arith.constant 8 : index
    %c0_36 = arith.constant 0 : index
    %54 = vector.load %arg6[%c8_35, %c0_36] : memref<9x256xf32, #tpu.memory_space<vmem>>, vector<1x256xf32>
    %55 = vector.broadcast %54 : vector<1x256xf32> to vector<4x256xf32>
    %56 = arith.mulf %53, %55 : vector<4x256xf32>
    %57 = arith.truncf %56 : vector<4x256xf32> to vector<4x256xbf16>
    %c32 = arith.constant 32 : index
    %c0_37 = arith.constant 0 : index
    %58 = vector.load %arg11[%c32, %c0_37] : memref<36x256xbf16, #tpu.memory_space<vmem>>, vector<4x256xbf16>
    tpu.vector_store %arg11[%c32, %c0_37], %57 {strides = array<i32>} : memref<36x256xbf16, #tpu.memory_space<vmem>>, vector<4x256xbf16>,
    %c0_38 = arith.constant 0 : index
    %c0_39 = arith.constant 0 : index
    %59 = vector.load %arg4[%c0_38, %c0_39] : memref<8x36xbf16, #tpu.memory_space<vmem>>, vector<8x36xbf16>
    %c0_40 = arith.constant 0 : index
    %c0_41 = arith.constant 0 : index
    %60 = vector.load %arg11[%c0_40, %c0_41] : memref<36x256xbf16, #tpu.memory_space<vmem>>, vector<36x256xbf16>
    %cst_42 = arith.constant dense<0.000000e+00> : vector<8x256xf32>
    %61 = tpu.matmul %59, %60, %cst_42 {dimension_numbers = #tpu.dot_dimension_numbers<[1], [0], [0], [1], [0, 0, 1, 1], [], []>} : vector<8x36xbf16>, vector<36x256xbf16>, vector<8x256xf32> -> vector<8x256xf32>
    %c0_43 = arith.constant 0 : index
    %c0_44 = arith.constant 0 : index
    %62 = vector.load %arg5[%c0_43, %c0_44] : memref<8x1xf32, #tpu.memory_space<vmem>>, vector<8x1xf32>
    %63 = vector.broadcast %62 : vector<8x1xf32> to vector<8x256xf32>
    %64 = arith.addf %61, %63 : vector<8x256xf32>
    %cst_45 = arith.constant dense<0.000000e+00> : vector<8xf32>
    %65 = vector.multi_reduction <add>, %64, %cst_45 [1] : vector<8x256xf32> to vector<8xf32>
    %66 = vector.shape_cast %65 : vector<8xf32> to vector<8x1xf32>
    %c0_46 = arith.constant 0 : index
    %c0_47 = arith.constant 0 : index
    %c0_48 = arith.constant 0 : index
    %67 = vector.load %arg8[%c0_46, %c0_47, %c0_48] : memref<1x8x1xf32, #tpu.memory_space<vmem>>, vector<1x8x1xf32>
    %68 = vector.shape_cast %67 : vector<1x8x1xf32> to vector<8x1xf32>
    %69 = vector.shape_cast %66 : vector<8x1xf32> to vector<1x8x1xf32>
    tpu.vector_store %arg8[%c0_46, %c0_47, %c0_48], %69 {strides = array<i32>} : memref<1x8x1xf32, #tpu.memory_space<vmem>>, vector<1x8x1xf32>,
    %70 = arith.mulf %64, %64 : vector<8x256xf32>
    %cst_49 = arith.constant dense<0.000000e+00> : vector<8xf32>
    %71 = vector.multi_reduction <add>, %70, %cst_49 [1] : vector<8x256xf32> to vector<8xf32>
    %72 = vector.shape_cast %71 : vector<8xf32> to vector<8x1xf32>
    %c0_50 = arith.constant 0 : index
    %c0_51 = arith.constant 0 : index
    %c0_52 = arith.constant 0 : index
    %73 = vector.load %arg9[%c0_50, %c0_51, %c0_52] : memref<1x8x1xf32, #tpu.memory_space<vmem>>, vector<1x8x1xf32>
    %74 = vector.shape_cast %73 : vector<1x8x1xf32> to vector<8x1xf32>
    %75 = vector.shape_cast %72 : vector<8x1xf32> to vector<1x8x1xf32>
    tpu.vector_store %arg9[%c0_50, %c0_51, %c0_52], %75 {strides = array<i32>} : memref<1x8x1xf32, #tpu.memory_space<vmem>>, vector<1x8x1xf32>,
    %76 = arith.truncf %64 : vector<8x256xf32> to vector<8x256xbf16>
    %c0_53 = arith.constant 0 : index
    %c0_54 = arith.constant 0 : index
    %c0_55 = arith.constant 0 : index
    %77 = vector.load %arg7[%c0_53, %c0_54, %c0_55] : memref<1x8x256xbf16, #tpu.memory_space<vmem>>, vector<1x8x256xbf16>
    %78 = vector.shape_cast %77 : vector<1x8x256xbf16> to vector<8x256xbf16>
    %79 = vector.shape_cast %76 : vector<8x256xbf16> to vector<1x8x256xbf16>
    tpu.vector_store %arg7[%c0_53, %c0_54, %c0_55], %79 {strides = array<i32>} : memref<1x8x256xbf16, #tpu.memory_space<vmem>>, vector<1x8x256xbf16>,
    return
  }
  func.func @transform_0(%arg0: i32) -> (i32, i32, i32) {
    %c0_i32 = arith.constant 0 : i32
    %c0_i32_0 = arith.constant 0 : i32
    %c0_i32_1 = arith.constant 0 : i32
    return %arg0, %c0_i32, %c0_i32_0 : i32, i32, i32
  }
  func.func @transform_1(%arg0: i32) -> (i32, i32) {
    %c0_i32 = arith.constant 0 : i32
    %c0_i32_0 = arith.constant 0 : i32
    %c0_i32_1 = arith.constant 0 : i32
    return %c0_i32, %c0_i32_0 : i32, i32
  }
  func.func @transform_2(%arg0: i32) -> (i32, i32) {
    %c0_i32 = arith.constant 0 : i32
    %c0_i32_0 = arith.constant 0 : i32
    %c0_i32_1 = arith.constant 0 : i32
    return %c0_i32, %c0_i32_0 : i32, i32
  }
  func.func @transform_3(%arg0: i32) -> (i32, i32) {
    %c0_i32 = arith.constant 0 : i32
    %c0_i32_0 = arith.constant 0 : i32
    %c0_i32_1 = arith.constant 0 : i32
    return %c0_i32, %c0_i32_0 : i32, i32
  }
  func.func @transform_4(%arg0: i32) -> (i32, i32) {
    %c0_i32 = arith.constant 0 : i32
    %c0_i32_0 = arith.constant 0 : i32
    %c0_i32_1 = arith.constant 0 : i32
    return %c0_i32, %c0_i32_0 : i32, i32
  }
  func.func @transform_5(%arg0: i32) -> (i32, i32) {
    %c0_i32 = arith.constant 0 : i32
    %c0_i32_0 = arith.constant 0 : i32
    %c0_i32_1 = arith.constant 0 : i32
    return %c0_i32, %c0_i32_0 : i32, i32
  }
  func.func @transform_6(%arg0: i32) -> (i32, i32, i32) {
    %c0_i32 = arith.constant 0 : i32
    %c0_i32_0 = arith.constant 0 : i32
    %c0_i32_1 = arith.constant 0 : i32
    return %arg0, %c0_i32, %c0_i32_0 : i32, i32, i32
  }
  func.func @transform_7(%arg0: i32) -> (i32, i32, i32) {
    %c0_i32 = arith.constant 0 : i32
    %c0_i32_0 = arith.constant 0 : i32
    %c0_i32_1 = arith.constant 0 : i32
    return %arg0, %c0_i32, %c0_i32_0 : i32, i32, i32
  }
  func.func @transform_8(%arg0: i32) -> (i32, i32, i32) {
    %c0_i32 = arith.constant 0 : i32
    %c0_i32_0 = arith.constant 0 : i32
    %c0_i32_1 = arith.constant 0 : i32
    return %arg0, %c0_i32, %c0_i32_0 : i32, i32, i32
  }
}

module attributes {stable_mosaic.version = 11 : i64} {
  func.func @_conv2_kernel(%arg0: i32, %arg1: memref<1x8x256xbf16, #tpu.memory_space<vmem>>, %arg2: memref<1x4x256xf32, #tpu.memory_space<vmem>>, %arg3: memref<8x1xf32, #tpu.memory_space<vmem>>, %arg4: memref<8x1xf32, #tpu.memory_space<vmem>>, %arg5: memref<4x72xbf16, #tpu.memory_space<vmem>>, %arg6: memref<4x1xf32, #tpu.memory_space<vmem>>, %arg7: memref<9x256xf32, #tpu.memory_space<vmem>>, %arg8: memref<1x4x256xf32, #tpu.memory_space<vmem>>, %arg9: memref<8x401xf32, #tpu.memory_space<vmem>>, %arg10: memref<72x256xbf16, #tpu.memory_space<vmem>>) attributes {dimension_semantics = [#tpu.dimension_semantics<parallel>], iteration_bounds = array<i64: 2>, scalar_prefetch = 0 : i64, scratch_operands = 2 : i64, tpu.core_type = #tpu.core_type<tc>, window_params = [{transform_indices = @transform_0, window_bounds = array<i64: 1, 8, 256>}, {transform_indices = @transform_1, window_bounds = array<i64: 1, 4, 256>}, {pipeline_mode = #tpu.pipeline_mode<synchronous>, transform_indices = @transform_2, window_bounds = array<i64: 8, 1>}, {pipeline_mode = #tpu.pipeline_mode<synchronous>, transform_indices = @transform_3, window_bounds = array<i64: 8, 1>}, {pipeline_mode = #tpu.pipeline_mode<synchronous>, transform_indices = @transform_4, window_bounds = array<i64: 4, 72>}, {pipeline_mode = #tpu.pipeline_mode<synchronous>, transform_indices = @transform_5, window_bounds = array<i64: 4, 1>}, {pipeline_mode = #tpu.pipeline_mode<synchronous>, transform_indices = @transform_6, window_bounds = array<i64: 9, 256>}, {transform_indices = @transform_7, window_bounds = array<i64: 1, 4, 256>}]} {
    %cst = arith.constant 0.000000e+00 : f32
    %0 = vector.broadcast %cst : f32 to vector<8x17xf32>
    %c0 = arith.constant 0 : index
    %c111 = arith.constant 111 : index
    %1 = vector.load %arg9[%c0, %c111] : memref<8x401xf32, #tpu.memory_space<vmem>>, vector<8x17xf32>
    tpu.vector_store %arg9[%c0, %c111], %0 {strides = array<i32>} : memref<8x401xf32, #tpu.memory_space<vmem>>, vector<8x17xf32>,
    %cst_0 = arith.constant 0.000000e+00 : f32
    %2 = vector.broadcast %cst_0 : f32 to vector<8x17xf32>
    %c0_1 = arith.constant 0 : index
    %c384 = arith.constant 384 : index
    %3 = vector.load %arg9[%c0_1, %c384] : memref<8x401xf32, #tpu.memory_space<vmem>>, vector<8x17xf32>
    tpu.vector_store %arg9[%c0_1, %c384], %2 {strides = array<i32>} : memref<8x401xf32, #tpu.memory_space<vmem>>, vector<8x17xf32>,
    %c0_2 = arith.constant 0 : index
    %c0_3 = arith.constant 0 : index
    %c0_4 = arith.constant 0 : index
    %4 = vector.load %arg1[%c0_2, %c0_3, %c0_4] : memref<1x8x256xbf16, #tpu.memory_space<vmem>>, vector<1x8x256xbf16>
    %5 = vector.shape_cast %4 : vector<1x8x256xbf16> to vector<8x256xbf16>
    %6 = arith.extf %5 : vector<8x256xbf16> to vector<8x256xf32>
    %c0_5 = arith.constant 0 : index
    %c0_6 = arith.constant 0 : index
    %7 = vector.load %arg3[%c0_5, %c0_6] : memref<8x1xf32, #tpu.memory_space<vmem>>, vector<8x1xf32>
    %8 = vector.broadcast %7 : vector<8x1xf32> to vector<8x256xf32>
    %9 = arith.mulf %6, %8 : vector<8x256xf32>
    %c0_7 = arith.constant 0 : index
    %c0_8 = arith.constant 0 : index
    %10 = vector.load %arg4[%c0_7, %c0_8] : memref<8x1xf32, #tpu.memory_space<vmem>>, vector<8x1xf32>
    %11 = vector.broadcast %10 : vector<8x1xf32> to vector<8x256xf32>
    %12 = arith.addf %9, %11 : vector<8x256xf32>
    %cst_9 = arith.constant 0.000000e+00 : f32
    %13 = vector.broadcast %cst_9 : f32 to vector<8x256xf32>
    %14 = arith.maximumf %12, %13 : vector<8x256xf32>
    %c0_10 = arith.constant 0 : index
    %c128 = arith.constant 128 : index
    %15 = vector.load %arg9[%c0_10, %c128] : memref<8x401xf32, #tpu.memory_space<vmem>>, vector<8x256xf32>
    tpu.vector_store %arg9[%c0_10, %c128], %14 {strides = array<i32>} : memref<8x401xf32, #tpu.memory_space<vmem>>, vector<8x256xf32>,
    %c0_11 = arith.constant 0 : index
    %c111_12 = arith.constant 111 : index
    %16 = vector.load %arg9[%c0_11, %c111_12] : memref<8x401xf32, #tpu.memory_space<vmem>>, vector<8x256xf32>
    %c0_13 = arith.constant 0 : index
    %c0_14 = arith.constant 0 : index
    %17 = vector.load %arg7[%c0_13, %c0_14] : memref<9x256xf32, #tpu.memory_space<vmem>>, vector<1x256xf32>
    %18 = vector.broadcast %17 : vector<1x256xf32> to vector<8x256xf32>
    %19 = arith.mulf %16, %18 : vector<8x256xf32>
    %20 = arith.truncf %19 : vector<8x256xf32> to vector<8x256xbf16>
    %c0_15 = arith.constant 0 : index
    %c0_16 = arith.constant 0 : index
    %21 = vector.load %arg10[%c0_15, %c0_16] : memref<72x256xbf16, #tpu.memory_space<vmem>>, vector<8x256xbf16>
    tpu.vector_store %arg10[%c0_15, %c0_16], %20 {strides = array<i32>} : memref<72x256xbf16, #tpu.memory_space<vmem>>, vector<8x256xbf16>,
    %c0_17 = arith.constant 0 : index
    %c112 = arith.constant 112 : index
    %22 = vector.load %arg9[%c0_17, %c112] : memref<8x401xf32, #tpu.memory_space<vmem>>, vector<8x256xf32>
    %23 = arith.truncf %22 : vector<8x256xf32> to vector<8x256xbf16>
    %c8 = arith.constant 8 : index
    %c0_18 = arith.constant 0 : index
    %24 = vector.load %arg10[%c8, %c0_18] : memref<72x256xbf16, #tpu.memory_space<vmem>>, vector<8x256xbf16>
    tpu.vector_store %arg10[%c8, %c0_18], %23 {strides = array<i32>} : memref<72x256xbf16, #tpu.memory_space<vmem>>, vector<8x256xbf16>,
    %c0_19 = arith.constant 0 : index
    %c113 = arith.constant 113 : index
    %25 = vector.load %arg9[%c0_19, %c113] : memref<8x401xf32, #tpu.memory_space<vmem>>, vector<8x256xf32>
    %c2 = arith.constant 2 : index
    %c0_20 = arith.constant 0 : index
    %26 = vector.load %arg7[%c2, %c0_20] : memref<9x256xf32, #tpu.memory_space<vmem>>, vector<1x256xf32>
    %27 = vector.broadcast %26 : vector<1x256xf32> to vector<8x256xf32>
    %28 = arith.mulf %25, %27 : vector<8x256xf32>
    %29 = arith.truncf %28 : vector<8x256xf32> to vector<8x256xbf16>
    %c16 = arith.constant 16 : index
    %c0_21 = arith.constant 0 : index
    %30 = vector.load %arg10[%c16, %c0_21] : memref<72x256xbf16, #tpu.memory_space<vmem>>, vector<8x256xbf16>
    tpu.vector_store %arg10[%c16, %c0_21], %29 {strides = array<i32>} : memref<72x256xbf16, #tpu.memory_space<vmem>>, vector<8x256xbf16>,
    %c0_22 = arith.constant 0 : index
    %c127 = arith.constant 127 : index
    %31 = vector.load %arg9[%c0_22, %c127] : memref<8x401xf32, #tpu.memory_space<vmem>>, vector<8x256xf32>
    %c3 = arith.constant 3 : index
    %c0_23 = arith.constant 0 : index
    %32 = vector.load %arg7[%c3, %c0_23] : memref<9x256xf32, #tpu.memory_space<vmem>>, vector<1x256xf32>
    %33 = vector.broadcast %32 : vector<1x256xf32> to vector<8x256xf32>
    %34 = arith.mulf %31, %33 : vector<8x256xf32>
    %35 = arith.truncf %34 : vector<8x256xf32> to vector<8x256xbf16>
    %c24 = arith.constant 24 : index
    %c0_24 = arith.constant 0 : index
    %36 = vector.load %arg10[%c24, %c0_24] : memref<72x256xbf16, #tpu.memory_space<vmem>>, vector<8x256xbf16>
    tpu.vector_store %arg10[%c24, %c0_24], %35 {strides = array<i32>} : memref<72x256xbf16, #tpu.memory_space<vmem>>, vector<8x256xbf16>,
    %37 = arith.truncf %14 : vector<8x256xf32> to vector<8x256xbf16>
    %c32 = arith.constant 32 : index
    %c0_25 = arith.constant 0 : index
    %38 = vector.load %arg10[%c32, %c0_25] : memref<72x256xbf16, #tpu.memory_space<vmem>>, vector<8x256xbf16>
    tpu.vector_store %arg10[%c32, %c0_25], %37 {strides = array<i32>} : memref<72x256xbf16, #tpu.memory_space<vmem>>, vector<8x256xbf16>,
    %c0_26 = arith.constant 0 : index
    %c129 = arith.constant 129 : index
    %39 = vector.load %arg9[%c0_26, %c129] : memref<8x401xf32, #tpu.memory_space<vmem>>, vector<8x256xf32>
    %c5 = arith.constant 5 : index
    %c0_27 = arith.constant 0 : index
    %40 = vector.load %arg7[%c5, %c0_27] : memref<9x256xf32, #tpu.memory_space<vmem>>, vector<1x256xf32>
    %41 = vector.broadcast %40 : vector<1x256xf32> to vector<8x256xf32>
    %42 = arith.mulf %39, %41 : vector<8x256xf32>
    %43 = arith.truncf %42 : vector<8x256xf32> to vector<8x256xbf16>
    %c40 = arith.constant 40 : index
    %c0_28 = arith.constant 0 : index
    %44 = vector.load %arg10[%c40, %c0_28] : memref<72x256xbf16, #tpu.memory_space<vmem>>, vector<8x256xbf16>
    tpu.vector_store %arg10[%c40, %c0_28], %43 {strides = array<i32>} : memref<72x256xbf16, #tpu.memory_space<vmem>>, vector<8x256xbf16>,
    %c0_29 = arith.constant 0 : index
    %c143 = arith.constant 143 : index
    %45 = vector.load %arg9[%c0_29, %c143] : memref<8x401xf32, #tpu.memory_space<vmem>>, vector<8x256xf32>
    %c6 = arith.constant 6 : index
    %c0_30 = arith.constant 0 : index
    %46 = vector.load %arg7[%c6, %c0_30] : memref<9x256xf32, #tpu.memory_space<vmem>>, vector<1x256xf32>
    %47 = vector.broadcast %46 : vector<1x256xf32> to vector<8x256xf32>
    %48 = arith.mulf %45, %47 : vector<8x256xf32>
    %49 = arith.truncf %48 : vector<8x256xf32> to vector<8x256xbf16>
    %c48 = arith.constant 48 : index
    %c0_31 = arith.constant 0 : index
    %50 = vector.load %arg10[%c48, %c0_31] : memref<72x256xbf16, #tpu.memory_space<vmem>>, vector<8x256xbf16>
    tpu.vector_store %arg10[%c48, %c0_31], %49 {strides = array<i32>} : memref<72x256xbf16, #tpu.memory_space<vmem>>, vector<8x256xbf16>,
    %c0_32 = arith.constant 0 : index
    %c144 = arith.constant 144 : index
    %51 = vector.load %arg9[%c0_32, %c144] : memref<8x401xf32, #tpu.memory_space<vmem>>, vector<8x256xf32>
    %52 = arith.truncf %51 : vector<8x256xf32> to vector<8x256xbf16>
    %c56 = arith.constant 56 : index
    %c0_33 = arith.constant 0 : index
    %53 = vector.load %arg10[%c56, %c0_33] : memref<72x256xbf16, #tpu.memory_space<vmem>>, vector<8x256xbf16>
    tpu.vector_store %arg10[%c56, %c0_33], %52 {strides = array<i32>} : memref<72x256xbf16, #tpu.memory_space<vmem>>, vector<8x256xbf16>,
    %c0_34 = arith.constant 0 : index
    %c145 = arith.constant 145 : index
    %54 = vector.load %arg9[%c0_34, %c145] : memref<8x401xf32, #tpu.memory_space<vmem>>, vector<8x256xf32>
    %c8_35 = arith.constant 8 : index
    %c0_36 = arith.constant 0 : index
    %55 = vector.load %arg7[%c8_35, %c0_36] : memref<9x256xf32, #tpu.memory_space<vmem>>, vector<1x256xf32>
    %56 = vector.broadcast %55 : vector<1x256xf32> to vector<8x256xf32>
    %57 = arith.mulf %54, %56 : vector<8x256xf32>
    %58 = arith.truncf %57 : vector<8x256xf32> to vector<8x256xbf16>
    %c64 = arith.constant 64 : index
    %c0_37 = arith.constant 0 : index
    %59 = vector.load %arg10[%c64, %c0_37] : memref<72x256xbf16, #tpu.memory_space<vmem>>, vector<8x256xbf16>
    tpu.vector_store %arg10[%c64, %c0_37], %58 {strides = array<i32>} : memref<72x256xbf16, #tpu.memory_space<vmem>>, vector<8x256xbf16>,
    %c0_38 = arith.constant 0 : index
    %c0_39 = arith.constant 0 : index
    %60 = vector.load %arg5[%c0_38, %c0_39] : memref<4x72xbf16, #tpu.memory_space<vmem>>, vector<4x72xbf16>
    %c0_40 = arith.constant 0 : index
    %c0_41 = arith.constant 0 : index
    %61 = vector.load %arg10[%c0_40, %c0_41] : memref<72x256xbf16, #tpu.memory_space<vmem>>, vector<72x256xbf16>
    %cst_42 = arith.constant dense<0.000000e+00> : vector<4x256xf32>
    %62 = tpu.matmul %60, %61, %cst_42 {dimension_numbers = #tpu.dot_dimension_numbers<[1], [0], [0], [1], [0, 0, 1, 1], [], []>} : vector<4x72xbf16>, vector<72x256xbf16>, vector<4x256xf32> -> vector<4x256xf32>
    %c0_43 = arith.constant 0 : index
    %c0_44 = arith.constant 0 : index
    %63 = vector.load %arg6[%c0_43, %c0_44] : memref<4x1xf32, #tpu.memory_space<vmem>>, vector<4x1xf32>
    %64 = vector.broadcast %63 : vector<4x1xf32> to vector<4x256xf32>
    %65 = arith.addf %62, %64 : vector<4x256xf32>
    %c0_45 = arith.constant 0 : index
    %c0_46 = arith.constant 0 : index
    %c0_47 = arith.constant 0 : index
    %66 = vector.load %arg2[%c0_45, %c0_46, %c0_47] : memref<1x4x256xf32, #tpu.memory_space<vmem>>, vector<1x4x256xf32>
    %67 = vector.shape_cast %66 : vector<1x4x256xf32> to vector<4x256xf32>
    %68 = arith.addf %65, %67 : vector<4x256xf32>
    %c0_48 = arith.constant 0 : index
    %c0_49 = arith.constant 0 : index
    %c0_50 = arith.constant 0 : index
    %69 = vector.load %arg8[%c0_48, %c0_49, %c0_50] : memref<1x4x256xf32, #tpu.memory_space<vmem>>, vector<1x4x256xf32>
    %70 = vector.shape_cast %69 : vector<1x4x256xf32> to vector<4x256xf32>
    %71 = vector.shape_cast %68 : vector<4x256xf32> to vector<1x4x256xf32>
    tpu.vector_store %arg8[%c0_48, %c0_49, %c0_50], %71 {strides = array<i32>} : memref<1x4x256xf32, #tpu.memory_space<vmem>>, vector<1x4x256xf32>,
    return
  }
  func.func @transform_0(%arg0: i32) -> (i32, i32, i32) {
    %c0_i32 = arith.constant 0 : i32
    %c0_i32_0 = arith.constant 0 : i32
    %c0_i32_1 = arith.constant 0 : i32
    return %arg0, %c0_i32, %c0_i32_0 : i32, i32, i32
  }
  func.func @transform_1(%arg0: i32) -> (i32, i32, i32) {
    %c0_i32 = arith.constant 0 : i32
    %c0_i32_0 = arith.constant 0 : i32
    %c0_i32_1 = arith.constant 0 : i32
    return %arg0, %c0_i32, %c0_i32_0 : i32, i32, i32
  }
  func.func @transform_2(%arg0: i32) -> (i32, i32) {
    %c0_i32 = arith.constant 0 : i32
    %c0_i32_0 = arith.constant 0 : i32
    %c0_i32_1 = arith.constant 0 : i32
    return %c0_i32, %c0_i32_0 : i32, i32
  }
  func.func @transform_3(%arg0: i32) -> (i32, i32) {
    %c0_i32 = arith.constant 0 : i32
    %c0_i32_0 = arith.constant 0 : i32
    %c0_i32_1 = arith.constant 0 : i32
    return %c0_i32, %c0_i32_0 : i32, i32
  }
  func.func @transform_4(%arg0: i32) -> (i32, i32) {
    %c0_i32 = arith.constant 0 : i32
    %c0_i32_0 = arith.constant 0 : i32
    %c0_i32_1 = arith.constant 0 : i32
    return %c0_i32, %c0_i32_0 : i32, i32
  }
  func.func @transform_5(%arg0: i32) -> (i32, i32) {
    %c0_i32 = arith.constant 0 : i32
    %c0_i32_0 = arith.constant 0 : i32
    %c0_i32_1 = arith.constant 0 : i32
    return %c0_i32, %c0_i32_0 : i32, i32
  }
  func.func @transform_6(%arg0: i32) -> (i32, i32) {
    %c0_i32 = arith.constant 0 : i32
    %c0_i32_0 = arith.constant 0 : i32
    %c0_i32_1 = arith.constant 0 : i32
    return %c0_i32, %c0_i32_0 : i32, i32
  }
  func.func @transform_7(%arg0: i32) -> (i32, i32, i32) {
    %c0_i32 = arith.constant 0 : i32
    %c0_i32_0 = arith.constant 0 : i32
    %c0_i32_1 = arith.constant 0 : i32
    return %arg0, %c0_i32, %c0_i32_0 : i32, i32, i32
  }
}

</mosaic_0001>

<bundles_post_ra>
// kernel: pre_activation_block.3
= control target key start
LH: loop header
LB: loop body
LE: loop exit
PB: predicated region body
PF: predicated region fallthrough
CT: control target
= control target key end

     0   :  { %s305_s9 = smov 0   ;;  %s325_s0 = inlined_call_operand.vmem [shape: f32[2,4,256], index: 0, kind: input, shape index: {}]   ;;  %s326_s1 = inlined_call_operand.vmem [shape: f32[2,4,1], index: 1, kind: output, shape index: {0}]   ;;  %s327_s2 = inlined_call_operand.vmem [shape: f32[2,4,1], index: 2, kind: output, shape index: {1}]  }
   0x1 LB: > { %s261_s10 = sadd.s32 4294967295, %s288_s9   ;;  %p265_p0 = scmp.ge.s32.totalorder %s288_s9, 1  ;;  %s288_s9 = sphi %s305_s9, %s13_s9  }
   0x2   : > { %p115_p1 = scmp.lt.s32.totalorder %s288_s9, 3 }
   0x4   : > { %p116_p2 = pnand %p265_p0, %p115_p1 }
   0x5   : > { %p140_p3 = scmp.lt.s32.totalorder (!%p116_p2), %s261_s10, 1 }
   0x6   : > { %119 = sbr.rel (%p116_p2) target bundleno = 163 (0xa3), region = 24 }
   0xb   : > { %s329_s10 = smov (!%p140_p3, %s261_s10), 1  ;;  %vm157_vm0 = vcmask 1043456   ;;  %vm174_vm1 = vcmask 3072  }
   0xc   : > { %s272_s11 = sshll.u32 %s329_s10, 3  ;;  %s268_s15 = sshll.u32 %s329_s10, 2 }
   0xd   : > { %s144_s14 = scalar_lea.vmem %s325_s0, %s272_s11  ;;  %s148_s18 = scalar_lea.vmem %s326_s1, %s268_s15 }
   0xe   : > { %v153_v0 = vld [vmem:[%s144_s14] sm:$0xff]  ;;  %s152_s21 = scalar_lea.vmem %s327_s2, %s268_s15 }
   0xf   : > { %v155_v1 = vcombine.high %v153_v0, %v153_v0  ;;  %v158_v2 = vsel %vm157_vm0, %v153_v0, 0.0  ;;  %v164_v3 = vmul.f32 %v153_v0, %v153_v0 }
  0x11   : > { %v159_v4 = vsel %vm157_vm0, %v155_v1, 0.0  ;;  %v166_v5 = vcombine.high %v164_v3, %v164_v3  ;;  %v168_v6 = vsel %vm157_vm0, %v164_v3, 0.0 }
  0x12   : > { %v160_v7 = vadd.f32 %v159_v4, %v158_v2 }
  0x13   : > { %v169_v8 = vsel %vm157_vm0, %v166_v5, 0.0 }
  0x14   : > { %161 = vadd.xlane.f32.xlu0 %v160_v7  ;;  %v170_v9 = vadd.f32 %v169_v8, %v168_v6 }
  0x18   : > { %171 = vadd.xlane.f32.xlu0 %v170_v9 }
  0x9d   : > { %v162_v10 = vpop.xlane.xlu0 %161 }
  0x9e   : > { %175 = vst.msk [vmem:[%s148_s18] sm:$0xf] %vm174_vm1, %v162_v10 }
  0xa1   : > { %v172_v11 = vpop.xlane.xlu0 %171 }
  0xa2   : > { %176 = vst.msk [vmem:[%s152_s21] sm:$0xf] %vm174_vm1, %v172_v11 }
  0xa3 PF: > { %s13_s9 = sadd.s32 1, %s288_s9  }
  0xa4   : > { %p10_p4 = scmp.ge.s32.totalorder %s13_s9, 4  }
  0xa6   :  { %12 = sbr.rel (!%p10_p4) target bundleno = 1 (0x1), region = 66 }

// kernel: pre_activation_block.5
= control target key start
LH: loop header
LB: loop body
LE: loop exit
PB: predicated region body
PF: predicated region fallthrough
CT: control target
= control target key end

     0   :  { %s1009_s24 = smov 0   ;;  %s1132_s0 = inlined_call_operand.vmem [shape: bf16[2,8,256], index: 0, kind: input, shape index: {}]   ;;  %s1133_s1 = inlined_call_operand.vmem [shape: f32[2,4,256], index: 1, kind: input, shape index: {}, may-alias: {1,7}]   ;;  %s1134_s2 = inlined_call_operand.vmem [shape: f32[8,1], index: 2, kind: input, shape index: {}]   ;;  %s1135_s3 = inlined_call_operand.vmem [shape: f32[8,1], index: 3, kind: input, shape index: {}]   ;;  %s1136_s4 = inlined_call_operand.vmem [shape: bf16[4,72], index: 4, kind: input, shape index: {}]   ;;  %s1137_s5 = inlined_call_operand.vmem [shape: f32[4,1], index: 5, kind: input, shape index: {}]   ;;  %s1138_s6 = inlined_call_operand.vmem [shape: f32[9,256], index: 6, kind: input, shape index: {}]   ;;  %s1139_s7 = inlined_call_operand.vmem [shape: f32[2,4,256], index: 7, kind: output, shape index: {}, may-alias: {1,7}]  }
   0x1 LB: > { %s864_s25 = sadd.s32 4294967295, %s957_s24   ;;  %p868_p0 = scmp.ge.s32.totalorder %s957_s24, 1  ;;  %s957_s24 = sphi %s1009_s24, %s17_s24  }
   0x2   : > { %p247_p1 = scmp.lt.s32.totalorder %s957_s24, 3 }
   0x4   : > { %p248_p2 = pnand %p868_p0, %p247_p1 }
   0x5   : > { %s961_s11 = smov (!%p248_p2), 17   ;;  %s962_s14 = smov (!%p248_p2), 15  }
   0x6   : > { %251 = sbr.rel (%p248_p2) target bundleno = 502 (0x1f6), region = 48  ;;  %s963_s17 = smov (!%p248_p2), 1  }
   0x7   : > { %s964_s20 = smov (!%p248_p2), 113   ;;  %s965_s23 = smov (!%p248_p2), 127  }
   0x8   : > { %s966_s26 = smov (!%p248_p2), 111   ;;  %s967_s27 = smov (!%p248_p2), 112  }
   0x9   : > { %p284_p3 = scmp.lt.s32.totalorder (!%p248_p2), %s864_s25, 1 }
   0xb   : > { %v307_v0 = vld [vmem:[%s1134_s2] sm:$0xff]  ;;  %v332_v1 = vlaneseq  ;;  %v959_v2 = vmov 0   ;;  %v894_v5 = vld [vmem:[%s1138_s6 + $0x10] ss:$8 sm:$0x3]  ;;  %vm300_vm0 = vcmask 1048440  }
   0xc   : > { %949 = vset.pattern.permute.xlu0 %v959_v2  ;;  %777 = vmatprep.mubr.bf16.mxu0 %v959_v2  ;;  %v315_v4 = vld [vmem:[%s1135_s3] sm:$0xff]  ;;  %vm302_vm1 = vcmask 138240   ;;  %v960_v11 = vmov 0.0   ;;  %s1141_s25 = smov (!%p284_p3, %s864_s25), 1  ;;  %vm444_vm2 = vcmask 121856   ;;  %vm492_vm3 = vcmask 7168  }
   0xd   : > { %310 = vperm.xlu0 %949, %v307_v0   ;;  %v333_v3 = vshrl.u32 %v332_v1, 7  ;;  %v889_v8 = vld [vmem:[%s1138_s6 + $0x6] ss:$8 sm:$0x3]  ;;  %301 = vst.msk [vmem:[#allocation2] sm:$0xff] %vm300_vm0, %v960_v11  ;;  %s1059_s28 = sshll.u32 %s1141_s25, 3 }
   0xe   : > { %303 = vst.msk [vmem:[#allocation2 + $0x18] sm:$0xff] %vm302_vm1, %v960_v11  ;;  %v886_v13 = vld [vmem:[%s1138_s6 + $0x5] ss:$8 sm:$0x3]  ;;  %s288_s8 = scalar_lea.vmem %s1132_s0, %s1059_s28  ;;  %vm418_vm4 = vcmask 924672   ;;  %vm466_vm5 = vcmask 1039360   ;;  %s293_s15 = scalar_lea.vmem %s1133_s1, %s1059_s28 }
   0xf   : > { %v334_v6 = vsub.s32 0, %v333_v3  ;;  %v338_v7 = vsub.s32 1, %v333_v3  ;;  %v879_v16 = vld [vmem:[%s1138_s6 + $0x2] ss:$8 sm:$0x3]  ;;  %vm344_vm6 = vcmask 908288   ;;  %s298_s18 = scalar_lea.vmem %s1139_s7, %s1059_s28 }
  0x10   : > { %v882_v19 = vld [vmem:[%s1138_s6 + $0x3] ss:$8 sm:$0x3]  ;;  %v330_v22 = vld [vmem:[%s1138_s6] ss:$8 sm:$0x3] }
  0x11   : > { %318 = vperm.xlu0 %949, %v315_v4   ;;  %v635_v9 = vrot.slane %v894_v5, %v334_v6  ;;  %v562_v10 = vrot.slane %v889_v8, %v334_v6  ;;  %v639_v12 = vrot.slane %v894_v5, %v338_v7  ;;  %v514_v14 = vrot.slane %v886_v13, %v334_v6  ;;  %v304_v28 = vld [vmem:[%s288_s8] sm:$0xff]  ;;  %s968_s25 = smov 16  }
  0x12   : > { %v566_v15 = vrot.slane %v889_v8, %v338_v7  ;;  %v409_v17 = vrot.slane %v879_v16, %v334_v6  ;;  %v518_v18 = vrot.slane %v886_v13, %v338_v7  ;;  %v457_v20 = vrot.slane %v882_v19, %v334_v6 }
  0x13   : > { %640 = vrot.lane.b32.xlu1 %v635_v9, %s961_s11  ;;  %v413_v21 = vrot.slane %v879_v16, %v338_v7  ;;  %v335_v23 = vrot.slane %v330_v22, %v334_v6  ;;  %v461_v24 = vrot.slane %v882_v19, %v338_v7  ;;  %v339_v25 = vrot.slane %v330_v22, %v338_v7 }
  0x14   : > { %v305_v30 = vunpack.c.l.bf16 %v304_v28  ;;  %v306_v31 = vunpack.c.h.bf16 %v304_v28  ;;  %v400_v6 = vld [vmem:[#allocation2] sm:$0xff]  ;;  %vm369_vm7 = vcmask 1043456   ;;  %vm622_vm8 = vcmask 916480  }
  0x15   : > { %567 = vrot.lane.b32.xlu0 %v562_v10, %s962_s14  ;;  %v628_v26 = vld [vmem:[#allocation2 + $0x18] sm:$0xff]  ;;  %vm396_vm9 = vcmask 130048   ;;  %vm734_vm10 = vcmask 588800  }
  0x16   : > { %v928_v27 = vpack.c.bf16 %v628_v26, %v628_v26 }
  0x17   : > { %642 = vrot.lane.b32.xlu1 %v639_v12, %s961_s11 }
  0x19   : > { %519 = vrot.lane.b32.xlu0 %v514_v14, %s963_s17 }
  0x1b   : > { %569 = vrot.lane.b32.xlu1 %v566_v15, %s962_s14 }
  0x1d   : > { %414 = vrot.lane.b32.xlu0 %v409_v17, %s964_s20 }
  0x1f   : > { %521 = vrot.lane.b32.xlu1 %v518_v18, %s963_s17 }
  0x21   : > { %462 = vrot.lane.b32.xlu0 %v457_v20, %s965_s23 }
  0x23   : > { %416 = vrot.lane.b32.xlu1 %v413_v21, %s964_s20 }
  0x25   : > { %340 = vrot.lane.b32.xlu0 %v335_v23, %s966_s26 }
  0x27   : > { %464 = vrot.lane.b32.xlu1 %v461_v24, %s965_s23 }
  0x2b   : > { %342 = vrot.lane.b32.xlu1 %v339_v25, %s966_s26 }
  0x2f   : > { %617 = vrot.lane.b32.xlu1 %v928_v27, %s967_s27  ;;  %v683_v27 = vld [vmem:[%s1137_s5] sm:$0xf] }
  0x85   : > { %v641_v29 = vpop.permute.xlu1 %640 }
  0x88   : > { %v311_v32 = vpop.permute.xlu0 %310 }
  0x89   : > { %v643_v33 = vpop.permute.xlu1 %642  ;;  %v313_v35 = vmul.f32 %v311_v32, %v305_v30  ;;  %v314_v36 = vmul.f32 %v311_v32, %v306_v31 }
  0x8a   : > { %v650_v34 = vmul.f32 %v643_v33, %v628_v26  ;;  %v644_v47 = vsel %vm302_vm1, %v641_v29, %v643_v33 }
  0x8c   : > { %v930_v37 = vpack.c.bf16 %v650_v34, %v650_v34  ;;  %v319_v38 = vpop.permute.xlu0 %318 }
  0x8d   : > { %v321_v39 = vadd.f32 %v319_v38, %v313_v35  ;;  %v322_v40 = vadd.f32 %v319_v38, %v314_v36  ;;  %v570_v41 = vpop.permute.xlu1 %569 }
  0x8e   : > { %v578_v42 = vmul.f32 %v628_v26, %v570_v41  ;;  %664 = vrot.lane.b32.xlu1 %v930_v37, %s966_s26 }
  0x8f   : > { %v1066_v43 = vmax.f32 %v321_v39, 0.0  ;;  %v324_v44 = vmax.f32 %v322_v40, 0.0 }
  0x90   : > { %v926_v45 = vpack.c.bf16 %v578_v42, %v578_v42  ;;  %v568_v46 = vpop.permute.xlu0 %567 }
  0x91   : > { %v1070_v48 = vpack.c.bf16 %v324_v44, %v1066_v43  ;;  %v522_v49 = vpop.permute.xlu1 %521  ;;  %v648_v50 = vmul.f32 %v641_v29, %v1066_v43  ;;  %v572_v51 = vsel %vm444_vm2, %v568_v46, %v570_v41  ;;  %v649_v53 = vmul.f32 %v644_v47, %v324_v44 }
  0x92   : > { %v530_v52 = vmul.f32 %v628_v26, %v522_v49  ;;  %592 = vrot.lane.b32.xlu1 %v926_v45, %s964_s20  ;;  %v576_v56 = vmul.f32 %v568_v46, %v1066_v43  ;;  %v577_v57 = vmul.f32 %v572_v51, %v324_v44  ;;  %v917_v21 = vpack.c.bf16 %v324_v44, %v324_v44 }
  0x93   : > { %615 = vrot.lane.b32.xlu0 %v1070_v48, %s967_s27  ;;  %v929_v59 = vpack.c.bf16 %v649_v53, %v648_v50  ;;  %v916_v26 = vpack.c.bf16 %v1066_v43, %v400_v6 }
  0x94   : > { %v924_v54 = vpack.c.bf16 %v530_v52, %v530_v52  ;;  %v520_v55 = vpop.permute.xlu0 %519  ;;  %v925_v0 = vpack.c.bf16 %v577_v57, %v576_v56 }
  0x95   : > { %v417_v58 = vpop.permute.xlu1 %416  ;;  %v524_v60 = vsel %vm492_vm3, %v520_v55, %v522_v49  ;;  %v528_v1 = vmul.f32 %v520_v55, %v1066_v43 }
  0x96   : > { %v425_v61 = vmul.f32 %v417_v58, %v324_v44  ;;  %544 = vrot.lane.b32.xlu1 %v924_v54, %s965_s23  ;;  %v529_v2 = vmul.f32 %v524_v60, %v324_v44 }
  0x97   : > { %662 = vrot.lane.b32.xlu0 %v929_v59, %s966_s26 }
  0x98   : > { %v919_v62 = vpack.c.bf16 %v425_v61, %v425_v61  ;;  %v415_v63 = vpop.permute.xlu0 %414  ;;  %v923_v9 = vpack.c.bf16 %v529_v2, %v528_v1 }
  0x99   : > { %v465_v3 = vpop.permute.xlu1 %464  ;;  %v419_v4 = vsel %vm418_vm4, %v415_v63, %v417_v58  ;;  %v423_v10 = vmul.f32 %v415_v63, %v400_v6 }
  0x9a   : > { %v473_v5 = vmul.f32 %v465_v3, %v324_v44  ;;  %439 = vrot.lane.b32.xlu1 %v919_v62, %s962_s14  ;;  %v424_v11 = vmul.f32 %v419_v4, %v1066_v43 }
  0x9b   : > { %590 = vrot.lane.b32.xlu0 %v925_v0, %s964_s20 }
  0x9c   : > { %v921_v7 = vpack.c.bf16 %v473_v5, %v473_v5  ;;  %v463_v8 = vpop.permute.xlu0 %462  ;;  %v918_v17 = vpack.c.bf16 %v424_v11, %v423_v10 }
  0x9d   : > { %v343_v12 = vpop.permute.xlu1 %342  ;;  %v467_v13 = vsel %vm466_vm5, %v463_v8, %v465_v3  ;;  %v471_v18 = vmul.f32 %v463_v8, %v400_v6 }
  0x9e   : > { %v351_v14 = vmul.f32 %v343_v12, %v324_v44  ;;  %487 = vrot.lane.b32.xlu1 %v921_v7, %s963_s17  ;;  %v472_v19 = vmul.f32 %v467_v13, %v1066_v43 }
  0x9f   : > { %542 = vrot.lane.b32.xlu0 %v923_v9, %s965_s23 }
  0xa0   : > { %v915_v15 = vpack.c.bf16 %v351_v14, %v351_v14  ;;  %v341_v16 = vpop.permute.xlu0 %340  ;;  %v920_v22 = vpack.c.bf16 %v472_v19, %v471_v18 }
  0xa1   : > { %v345_v20 = vsel %vm344_vm6, %v341_v16, %v343_v12  ;;  %v349_v23 = vmul.f32 %v400_v6, %v341_v16  ;;  %v618_v28 = vpop.permute.xlu1 %617 }
  0xa2   : > { %365 = vrot.lane.b32.xlu1 %v915_v15, %s961_s11  ;;  %v350_v24 = vmul.f32 %v345_v20, %v1066_v43  ;;  %v620_v35 = vrot.slane %v618_v28, 4 }
  0xa3   : > { %437 = vrot.lane.b32.xlu0 %v918_v17, %s962_s14 }
  0xa4   : > { %v914_v25 = vpack.c.bf16 %v350_v24, %v349_v23  ;;  %v673_v23 = vld [vmem:[%s1136_s4] sm:$0x3] }
  0xa5   : > { %v786_v24 = vld [vmem:[%s293_s15] sm:$0xff] }
  0xa6   : > { %391 = vrot.lane.b32.xlu1 %v917_v21, %s968_s25  ;;  %v788_v28 = vcombine.high %v786_v24, %v786_v24 }
  0xa7   : > { %485 = vrot.lane.b32.xlu0 %v920_v22, %s963_s17 }
  0xab   : > { %363 = vrot.lane.b32.xlu0 %v914_v25, %s961_s11 }
  0xaf   : > { %389 = vrot.lane.b32.xlu0 %v916_v26, %s968_s25 }
  0xb3   : > { %686 = vperm.xlu0 %949, %v683_v27  }
 0x100   : > { %v665_v29 = vpop.permute.xlu1 %664 }
 0x101   : > { %v667_v32 = vrot.slane %v665_v29, 4 }
 0x104   : > { %v593_v30 = vpop.permute.xlu1 %592 }
 0x105   : > { %v616_v31 = vpop.permute.xlu0 %615  ;;  %v595_v38 = vrot.slane %v593_v30, 4 }
 0x106   : > { %v619_v36 = vrot.slane %v616_v31, 4 }
 0x108   : > { %v545_v33 = vpop.permute.xlu1 %544  ;;  %v621_v43 = vsel %vm369_vm7, %v619_v36, %v620_v35 }
 0x109   : > { %v663_v34 = vpop.permute.xlu0 %662  ;;  %v547_v47 = vrot.slane %v545_v33, 4  ;;  %v623_v51 = vsel %vm622_vm8, %v616_v31, %v621_v43 }
 0x10a   : > { %v666_v37 = vrot.slane %v663_v34, 4 }
 0x10c   : > { %v668_v39 = vsel %vm369_vm7, %v666_v37, %v667_v32  ;;  %v440_v40 = vpop.permute.xlu1 %439 }
 0x10d   : > { %v670_v41 = vsel %vm344_vm6, %v663_v34, %v668_v39  ;;  %v591_v42 = vpop.permute.xlu0 %590  ;;  %v442_v0 = vrot.slane %v440_v40, 4 }
 0x10e   : > { %v594_v44 = vrot.slane %v591_v42, 4  ;;  %v906_v45 = vcombine.high %v670_v41, %v670_v41  ;;  %v905_v46 = vcombine.low %v670_v41, %v670_v41 }
 0x110   : > { %v596_v49 = vsel %vm369_vm7, %v594_v44, %v595_v38  ;;  %907 = vmatprep.subr.msk.bf16.mxu0 %vm369_vm7, %v906_v45  ;;  %v740_v50 = vsel %vm369_vm7, %v905_v46, 0  ;;  %v488_v57 = vpop.permute.xlu1 %487 }
 0x111   : > { %v598_v52 = vsel %vm418_vm4, %v591_v42, %v596_v49  ;;  %752 = vmatpush1.bf16.msra.mxu0 %v740_v50  ;;  %v543_v53 = vpop.permute.xlu0 %542  ;;  %v490_v3 = vrot.slane %v488_v57, 4 }
 0x112   : > { %v903_v54 = vcombine.low %v598_v52, %v623_v51  ;;  %v904_v55 = vcombine.high %v598_v52, %v623_v51  ;;  %v546_v56 = vrot.slane %v543_v53, 4 }
 0x114   : > { %v548_v58 = vsel %vm369_vm7, %v546_v56, %v547_v47  ;;  %753 = vmatprep.subr.bf16.mxu0 %v904_v55  ;;  %v366_v1 = vpop.permute.xlu1 %365 }
 0x115   : > { %v550_v59 = vsel %vm466_vm5, %v543_v53, %v548_v58  ;;  %754 = vmatpush1.bf16.msra.mxu0 %v903_v54  ;;  %v438_v60 = vpop.permute.xlu0 %437  ;;  %v368_v13 = vrot.slane %v366_v1, 4 }
 0x116   : > { %v901_v61 = vcombine.low %v1070_v48, %v550_v59  ;;  %v902_v62 = vcombine.high %v1070_v48, %v550_v59  ;;  %v441_v63 = vrot.slane %v438_v60, 4 }
 0x118   : > { %755 = vmatprep.subr.bf16.mxu0 %v902_v62  ;;  %v443_v4 = vsel %vm369_vm7, %v441_v63, %v442_v0  ;;  %v392_v12 = vpop.permute.xlu1 %391 }
 0x119   : > { %756 = vmatpush1.bf16.msra.mxu0 %v901_v61  ;;  %v486_v2 = vpop.permute.xlu0 %485  ;;  %v445_v7 = vsel %vm444_vm2, %v438_v60, %v443_v4  ;;  %v394_v15 = vrot.slane %v392_v12, 4 }
 0x11a   : > { %v489_v5 = vrot.slane %v486_v2, 4 }
 0x11c   : > { %v491_v6 = vsel %vm369_vm7, %v489_v5, %v490_v3 }
 0x11d   : > { %v493_v8 = vsel %vm492_vm3, %v486_v2, %v491_v6  ;;  %v364_v9 = vpop.permute.xlu0 %363 }
 0x11e   : > { %v899_v10 = vcombine.low %v445_v7, %v493_v8  ;;  %v900_v11 = vcombine.high %v445_v7, %v493_v8  ;;  %v367_v48 = vrot.slane %v364_v9, 4 }
 0x120   : > { %757 = vmatprep.subr.bf16.mxu0 %v900_v11  ;;  %v370_v16 = vsel %vm369_vm7, %v367_v48, %v368_v13 }
 0x121   : > { %758 = vmatpush1.bf16.msra.mxu0 %v899_v10  ;;  %v390_v14 = vpop.permute.xlu0 %389  ;;  %v372_v19 = vsel %vm302_vm1, %v364_v9, %v370_v16 }
 0x122   : > { %v393_v17 = vrot.slane %v390_v14, 4 }
 0x124   : > { %v395_v18 = vsel %vm369_vm7, %v393_v17, %v394_v15 }
 0x125   : > { %v397_v20 = vsel %vm396_vm9, %v390_v14, %v395_v18 }
 0x126   : > { %v897_v21 = vcombine.low %v372_v19, %v397_v20  ;;  %v898_v22 = vcombine.high %v372_v19, %v397_v20 }
 0x128   : > { %759 = vmatprep.subr.bf16.mxu0 %v898_v22 }
 0x129   : > { %760 = vmatpush1.bf16.msra.mxu0 %v897_v21 }
 0x12c   : > { %908 = vmatmul.mubr.msk.bf16.vlgmr.msra.gmra.mxu0 %vm734_vm10, %v673_v23 }
 0x12e   : > { %v687_v25 = vpop.permute.xlu0 %686 }
 0x1ec   : > { %v779_v26 = vpop.f32.mrf.mxu0 }
 0x1ed   : > { %v780_v27 = vadd.f32 %v779_v26, %v687_v25 }
 0x1ee   : > { %v781_v29 = vpop.f32.mrf.mxu0 }
 0x1ef   : > { %v782_v30 = vadd.f32 %v781_v29, %v687_v25  ;;  %v790_v32 = vadd.f32 %v786_v24, %v780_v27 }
 0x1f0   : > { %v783_v31 = vpop.f32.mrf.mxu0 }
 0x1f1   : > { %v791_v33 = vadd.f32 %v788_v28, %v782_v30 }
 0x1f2   : > { %v784_v34 = vpop.f32.mrf.mxu0 }
 0x1f3   : > { %v794_v35 = vcombine.low %v790_v32, %v791_v33 }
 0x1f5   : > { %796 = vst [vmem:[%s298_s18] sm:$0xff] %v794_v35 }
 0x1f6 PF: > { %s17_s24 = sadd.s32 1, %s957_s24  }
 0x1f7   : > { %p14_p4 = scmp.ge.s32.totalorder %s17_s24, 4  }
 0x1f9   :  { %16 = sbr.rel (!%p14_p4) target bundleno = 1 (0x1), region = 86 }

// kernel: pre_activation_block.4
= control target key start
LH: loop header
LB: loop body
LE: loop exit
PB: predicated region body
PF: predicated region fallthrough
CT: control target
= control target key end

     0   :  { %s1107_s27 = smov 0   ;;  %s1212_s0 = inlined_call_operand.vmem [shape: f32[2,4,256], index: 0, kind: input, shape index: {}]   ;;  %s1213_s1 = inlined_call_operand.vmem [shape: f32[4,1], index: 1, kind: input, shape index: {}]   ;;  %s1214_s2 = inlined_call_operand.vmem [shape: f32[4,1], index: 2, kind: input, shape index: {}]   ;;  %s1215_s3 = inlined_call_operand.vmem [shape: bf16[8,36], index: 3, kind: input, shape index: {}]   ;;  %s1216_s4 = inlined_call_operand.vmem [shape: f32[8,1], index: 4, kind: input, shape index: {}]   ;;  %s1217_s5 = inlined_call_operand.vmem [shape: f32[9,256], index: 5, kind: input, shape index: {}]   ;;  %s1218_s6 = inlined_call_operand.vmem [shape: bf16[2,8,256], index: 6, kind: output, shape index: {0}]   ;;  %s1219_s7 = inlined_call_operand.vmem [shape: f32[2,8,1], index: 7, kind: output, shape index: {1}]   ;;  %s1220_s8 = inlined_call_operand.vmem [shape: f32[2,8,1], index: 8, kind: output, shape index: {2}]  }
   0x1 LB: > { %s950_s28 = sadd.s32 4294967295, %s1049_s27   ;;  %p954_p0 = scmp.ge.s32.totalorder %s1049_s27, 1  ;;  %s1049_s27 = sphi %s1107_s27, %s19_s27  }
   0x2   : > { %p267_p1 = scmp.lt.s32.totalorder %s1049_s27, 3 }
   0x4   : > { %p268_p2 = pnand %p954_p0, %p267_p1 }
   0x5   : > { %s1052_s21 = smov (!%p268_p2), 17   ;;  %s1053_s22 = smov (!%p268_p2), 15  }
   0x6   : > { %271 = sbr.rel (%p268_p2) target bundleno = 652 (0x28c), region = 44  ;;  %s1055_s25 = smov (!%p268_p2), 1  }
   0x7   : > { %s1056_s26 = smov (!%p268_p2), 111   ;;  %s1057_s29 = smov (!%p268_p2), 127  }
   0x8   : > { %s1058_s30 = smov (!%p268_p2), 113   ;;  %s1059_s9 = smov (!%p268_p2), 112  }
   0x9   : > { %p309_p3 = scmp.lt.s32.totalorder (!%p268_p2), %s950_s28, 1 }
   0xb   : > { %v333_v0 = vld [vmem:[%s1213_s1] sm:$0xf]  ;;  %v341_v1 = vlaneseq  ;;  %v1051_v2 = vmov 0   ;;  %v980_v5 = vld [vmem:[%s1217_s5 + $0x10] ss:$8 sm:$0x3] }
   0xc   : > { %1033 = vset.pattern.permute.xlu0 %v1051_v2  ;;  %805 = vmatprep.mubr.bf16.mxu0 %v1051_v2  ;;  %v347_v3 = vld [vmem:[%s1214_s2] sm:$0xf]  ;;  %v972_v6 = vld [vmem:[%s1217_s5 + $0x5] ss:$8 sm:$0x3]  ;;  %vm330_vm0 = vcmask 134144  }
   0xd   : > { %336 = vperm.xlu0 %1033, %v333_v0   ;;  %v342_v4 = vshrl.u32 %v341_v1, 7  ;;  %v975_v9 = vld [vmem:[%s1217_s5 + $0x6] ss:$8 sm:$0x3]  ;;  %v1054_v27 = vmov 0.0   ;;  %vm328_vm1 = vcmask 1044344  }
   0xe   : > { %v968_v14 = vld [vmem:[%s1217_s5 + $0x3] ss:$8 sm:$0x3]  ;;  %v365_v15 = vld [vmem:[%s1217_s5] ss:$8 sm:$0x3] }
   0xf   : > { %v369_v7 = vsub.s32 0, %v342_v4  ;;  %v373_v8 = vsub.s32 1, %v342_v4  ;;  %v965_v25 = vld [vmem:[%s1217_s5 + $0x2] ss:$8 sm:$0x3]  ;;  %s1222_s28 = smov (!%p309_p3, %s950_s28), 1 }
  0x10   : > { %331 = vst.msk [vmem:[#allocation2 + $0xc] sm:$0xf] %vm330_vm0, %v1054_v27  ;;  %v1060_v35 = vmov 839922192   ;;  %s1150_s10 = sshll.u32 %s1222_s28, 3  ;;  %vm407_vm2 = vcmask 138240  }
  0x11   : > { %350 = vperm.xlu0 %1033, %v347_v3   ;;  %v685_v10 = vrot.slane %v980_v5, %v369_v7  ;;  %v689_v11 = vrot.slane %v980_v5, %v373_v8  ;;  %v558_v12 = vrot.slane %v972_v6, %v369_v7  ;;  %v562_v13 = vrot.slane %v972_v6, %v373_v8  ;;  %s313_s13 = scalar_lea.vmem %s1212_s0, %s1150_s10  ;;  %s1061_s28 = smov 16  }
  0x12   : > { %v608_v16 = vrot.slane %v975_v9, %v369_v7  ;;  %v612_v17 = vrot.slane %v975_v9, %v373_v8  ;;  %v496_v20 = vrot.slane %v968_v14, %v369_v7  ;;  %v370_v21 = vrot.slane %v365_v15, %v369_v7  ;;  %329 = vst.msk [vmem:[#allocation2] sm:$0xf] %vm328_vm1, %v1054_v27  ;;  %v332_v44 = vld [vmem:[%s313_s13] sm:$0xff]  ;;  %s318_s20 = scalar_lea.vmem %s1218_s6, %s1150_s10  ;;  %s322_s23 = scalar_lea.vmem %s1219_s7, %s1150_s10 }
  0x13   : > { %v690_v18 = vcombine.low %v685_v10, %v689_v11  ;;  %v374_v22 = vrot.slane %v365_v15, %v373_v8  ;;  %v563_v23 = vcombine.low %v558_v12, %v562_v13  ;;  %v500_v24 = vrot.slane %v968_v14, %v373_v8 }
  0x14   : > { %v613_v19 = vcombine.low %v608_v16, %v612_v17  ;;  %v448_v29 = vrot.slane %v965_v25, %v369_v7  ;;  %v452_v30 = vrot.slane %v965_v25, %v373_v8  ;;  %v339_v36 = vunpack.c.l.s4 %v1060_v35 }
  0x15   : > { %691 = vrot.lane.b32.xlu1 %v690_v18, %s1052_s21  ;;  %v375_v26 = vcombine.low %v370_v21, %v374_v22  ;;  %v501_v28 = vcombine.low %v496_v20, %v500_v24  ;;  %vm484_vm3 = vcmask 121856   ;;  %vm379_vm4 = vcmask 908288  }
  0x16   : > { %614 = vrot.lane.b32.xlu0 %v613_v19, %s1053_s22  ;;  %v453_v31 = vcombine.low %v448_v29, %v452_v30  ;;  %v340_v37 = vunpack.c.0.s8 %v339_v36  ;;  %vm534_vm5 = vcmask 7168   ;;  %vm457_vm6 = vcmask 924672  }
  0x17   : > { %v649_v32 = vld [vmem:[#allocation2 + $0xc] sm:$0xf]  ;;  %vm505_vm7 = vcmask 1039360   ;;  %vm405_vm8 = vcmask 1043456   ;;  %vm673_vm9 = vcmask 916480   ;;  %vm766_vm10 = vcmask 1041408  }
  0x18   : > { %v1010_v33 = vpack.c.bf16 %v649_v32, %v649_v32  ;;  %v343_v38 = vsub.s32 %v340_v37, %v342_v4  ;;  %v678_v40 = vld [vmem:[#allocation2 + $0xc] sm:$0xf]  ;;  %vm436_vm11 = vcmask 130048   ;;  %vm762_vm12 = vcmask 293888  }
  0x19   : > { %564 = vrot.lane.b32.xlu1 %v563_v23, %s1055_s25  ;;  %v551_v48 = vld [vmem:[#allocation2 + $0xc] sm:$0xf] }
  0x1a   : > { %376 = vrot.lane.b32.xlu0 %v375_v26, %s1056_s26  ;;  %v665_v34 = vrot.slane %v1010_v33, 6  ;;  %v601_v56 = vld [vmem:[#allocation2 + $0xc] sm:$0xf] }
  0x1d   : > { %502 = vrot.lane.b32.xlu1 %v501_v28, %s1057_s29 }
  0x21   : > { %454 = vrot.lane.b32.xlu1 %v453_v31, %s1058_s30 }
  0x25   : > { %668 = vrot.lane.b32.xlu1 %v665_v34, %s1059_s9 }
  0x87   : > { %v692_v39 = vpop.permute.xlu1 %691 }
  0x88   : > { %v337_v41 = vpop.permute.xlu0 %336  ;;  %v693_v42 = vrot.slane %v692_v39, 4 }
  0x89   : > { %v344_v43 = vrot.slane %v337_v41, %v343_v38 }
  0x8a   : > { %v699_v45 = vmul.f32 %v693_v42, %v678_v40  ;;  %v695_v59 = vsel %vm407_vm2, %v693_v42, %v692_v39 }
  0x8b   : > { %v565_v46 = vpop.permute.xlu1 %564  ;;  %v346_v50 = vmul.f32 %v344_v43, %v332_v44 }
  0x8c   : > { %v351_v47 = vpop.permute.xlu0 %350  ;;  %v1012_v49 = vpack.c.bf16 %v699_v45, %v699_v45  ;;  %v566_v52 = vrot.slane %v565_v46, 4 }
  0x8d   : > { %v358_v51 = vrot.slane %v351_v47, %v343_v38 }
  0x8e   : > { %716 = vrot.lane.b32.xlu1 %v1012_v49, %s1056_s26  ;;  %v572_v54 = vmul.f32 %v566_v52, %v551_v48  ;;  %v568_v28 = vsel %vm534_vm5, %v566_v52, %v565_v46 }
  0x8f   : > { %v360_v53 = vadd.f32 %v358_v51, %v346_v50  ;;  %v503_v1 = vpop.permute.xlu1 %502  ;;  %v731_v51 = vld [vmem:[%s1216_s4] sm:$0xff] }
  0x90   : > { %v615_v55 = vpop.permute.xlu0 %614  ;;  %v1006_v61 = vpack.c.bf16 %v572_v54, %v572_v54  ;;  %v504_v20 = vrot.slane %v503_v1, 4 }
  0x91   : > { %v361_v57 = vmax.f32 %v360_v53, 0.0  ;;  %v616_v58 = vrot.slane %v615_v55, 4 }
  0x92   : > { %v588_v8 = vrot.slane %v1006_v61, 6  ;;  %v506_v37 = vsel %vm505_vm7, %v504_v20, %v503_v1 }
  0x93   : > { %362 = vst [vmem:[#allocation2 + $0x4] sm:$0xff] %v361_v57  ;;  %v539_v60 = vcombine.high %v361_v57, %v361_v57  ;;  %v618_v62 = vsel %vm484_vm3, %v616_v58, %v615_v55  ;;  %v622_v63 = vmul.f32 %v616_v58, %v601_v56  ;;  %v698_v3 = vmul.f32 %v695_v59, %v361_v57  ;;  %v455_v13 = vpop.permute.xlu1 %454 }
  0x94   : > { %v621_v0 = vmul.f32 %v618_v62, %v361_v57  ;;  %v377_v2 = vpop.permute.xlu0 %376  ;;  %v456_v19 = vrot.slane %v455_v13, 4  ;;  %v571_v33 = vmul.f32 %v568_v28, %v361_v57 }
  0x95   : > { %v1004_v4 = vpack.c.bf16 %v539_v60, %v361_v57  ;;  %v378_v5 = vrot.slane %v377_v2, 4  ;;  %v1008_v6 = vpack.c.bf16 %v622_v63, %v622_v63  ;;  %v701_v7 = vcombine.high %v698_v3, %v698_v3 }
  0x96   : > { %v624_v9 = vcombine.high %v621_v0, %v621_v0  ;;  %v458_v29 = vsel %vm457_vm6, %v456_v19, %v455_v13  ;;  %v574_v40 = vcombine.high %v571_v33, %v571_v33 }
  0x97   : > { %549 = vst [vmem:[#allocation3 + $0x20] sm:$0x33] %v1004_v4  ;;  %639 = vrot.lane.b32.xlu1 %v1008_v6, %s1058_s30  ;;  %v1011_v10 = vpack.c.bf16 %v701_v7, %v698_v3  ;;  %v380_v11 = vsel %vm379_vm4, %v378_v5, %v377_v2  ;;  %v664_v26 = vrot.slane %v1004_v4, 6  ;;  %v669_v52 = vpop.permute.xlu1 %668 }
  0x98   : > { %v1007_v18 = vpack.c.bf16 %v624_v9, %v621_v0  ;;  %v1005_v47 = vpack.c.bf16 %v574_v40, %v571_v33  ;;  %v671_v4 = vrot.slane %v669_v52, 4 }
  0x99   : > { %714 = vrot.lane.b32.xlu0 %v1011_v10, %s1056_s26  ;;  %s326_s26 = scalar_lea.vmem %s1220_s8, %s1150_s10 }
  0x9a   : > { %v488_v12 = vld [vmem:[#allocation2] sm:$0xff]  ;;  %v364_v14 = vld [vmem:[#allocation2 + $0x8] sm:$0xf]  ;;  %v587_v48 = vrot.slane %v1005_v47, 6 }
  0x9b   : > { %591 = vrot.lane.b32.xlu1 %v588_v8, %s1057_s29  ;;  %v412_v15 = vld [vmem:[#allocation2 + $0x8] sm:$0xf]  ;;  %v383_v16 = vmul.f32 %v488_v12, %v380_v11  ;;  %v384_v17 = vmul.f32 %v378_v5, %v364_v14  ;;  %v414_v27 = vcombine.high %v488_v12, %v488_v12  ;;  %v461_v34 = vmul.f32 %v488_v12, %v458_v29 }
  0x9c   : > { %v999_v22 = vpack.c.bf16 %v412_v15, %v412_v15  ;;  %v489_v23 = vld [vmem:[#allocation2 + $0x8] sm:$0xf]  ;;  %v509_v41 = vmul.f32 %v506_v37, %v488_v12 }
  0x9d   : > { %v997_v21 = vpack.c.bf16 %v384_v17, %v384_v17  ;;  %637 = vrot.lane.b32.xlu0 %v1007_v18, %s1058_s30  ;;  %v441_v24 = vld [vmem:[#allocation2 + $0x8] sm:$0xf]  ;;  %v386_v25 = vcombine.high %v383_v16, %v383_v16  ;;  %v510_v30 = vmul.f32 %v504_v20, %v489_v23  ;;  %v998_v36 = vpack.c.bf16 %v414_v27, %v488_v12 }
  0x9e   : > { %v462_v31 = vmul.f32 %v456_v19, %v441_v24  ;;  %v428_v32 = vrot.slane %v999_v22, 6  ;;  %v464_v42 = vcombine.high %v461_v34, %v461_v34  ;;  %v512_v45 = vcombine.high %v509_v41, %v509_v41 }
  0x9f   : > { %401 = vrot.lane.b32.xlu1 %v997_v21, %s1052_s21  ;;  %v996_v35 = vpack.c.bf16 %v386_v25, %v383_v16  ;;  %v1003_v38 = vpack.c.bf16 %v510_v30, %v510_v30  ;;  %v427_v43 = vrot.slane %v998_v36, 6 }
  0xa0   : > { %v1001_v39 = vpack.c.bf16 %v462_v31, %v462_v31  ;;  %v1000_v46 = vpack.c.bf16 %v464_v42, %v461_v34  ;;  %v1002_v49 = vpack.c.bf16 %v512_v45, %v509_v41 }
  0xa1   : > { %666 = vrot.lane.b32.xlu0 %v664_v26, %s1059_s9  ;;  %v526_v44 = vrot.slane %v1003_v38, 6 }
  0xa2   : > { %v525_v50 = vrot.slane %v1002_v49, 6 }
  0xa3   : > { %431 = vrot.lane.b32.xlu1 %v428_v32, %s1061_s28 }
  0xa5   : > { %399 = vrot.lane.b32.xlu0 %v996_v35, %s1052_s21 }
  0xa7   : > { %479 = vrot.lane.b32.xlu1 %v1001_v39, %s1053_s22 }
  0xa9   : > { %429 = vrot.lane.b32.xlu0 %v427_v43, %s1061_s28 }
  0xab   : > { %529 = vrot.lane.b32.xlu1 %v526_v44, %s1055_s25  ;;  %v725_v44 = vld [vmem:[%s1215_s3] sm:$0xf] }
  0xad   : > { %477 = vrot.lane.b32.xlu0 %v1000_v46, %s1053_s22 }
  0xb1   : > { %589 = vrot.lane.b32.xlu0 %v587_v48, %s1057_s29 }
  0xb5   : > { %527 = vrot.lane.b32.xlu0 %v525_v50, %s1055_s25 }
  0xb9   : > { %734 = vperm.xlu0 %1033, %v731_v51  }
 0x100   : > { %v717_v53 = vpop.permute.xlu1 %716 }
 0x101   : > { %v719_v56 = vrot.slane %v717_v53, 4 }
 0x109   : > { %v640_v54 = vpop.permute.xlu1 %639 }
 0x10a   : > { %v642_v62 = vrot.slane %v640_v54, 4 }
 0x10b   : > { %v715_v55 = vpop.permute.xlu0 %714 }
 0x10c   : > { %v718_v58 = vrot.slane %v715_v55, 4 }
 0x10d   : > { %v592_v57 = vpop.permute.xlu1 %591 }
 0x10e   : > { %v720_v59 = vsel %vm405_vm8, %v718_v58, %v719_v56  ;;  %v594_v30 = vrot.slane %v592_v57, 4 }
 0x10f   : > { %v722_v60 = vsel %vm379_vm4, %v715_v55, %v720_v59  ;;  %v638_v61 = vpop.permute.xlu0 %637 }
 0x110   : > { %724 = vst [vmem:[#allocation3 + $0x18] sm:$0x33] %v722_v60  ;;  %v641_v63 = vrot.slane %v638_v61, 4 }
 0x111   : > { %v402_v0 = vpop.permute.xlu1 %401 }
 0x112   : > { %v643_v1 = vsel %vm405_vm8, %v641_v63, %v642_v62  ;;  %v404_v11 = vrot.slane %v402_v0, 4 }
 0x113   : > { %v645_v2 = vsel %vm457_vm6, %v638_v61, %v643_v1  ;;  %v667_v3 = vpop.permute.xlu0 %666 }
 0x114   : > { %647 = vst [vmem:[#allocation3 + $0x10] sm:$0x33] %v645_v2  ;;  %v670_v5 = vrot.slane %v667_v3, 4 }
 0x115   : > { %v432_v7 = vpop.permute.xlu1 %431 }
 0x116   : > { %v672_v6 = vsel %vm405_vm8, %v670_v5, %v671_v4  ;;  %v434_v19 = vrot.slane %v432_v7, 4 }
 0x117   : > { %v674_v8 = vsel %vm673_vm9, %v667_v3, %v672_v6  ;;  %v400_v9 = vpop.permute.xlu0 %399  ;;  %v730_v10 = vld [vmem:[#allocation3 + $0x18] sm:$0x33] }
 0x118   : > { %676 = vst [vmem:[#allocation3 + $0x10] sm:$0xcc] %v674_v8  ;;  %v403_v12 = vrot.slane %v400_v9, 4  ;;  %v988_v13 = vcombine.high %v730_v10, %v730_v10  ;;  %v987_v14 = vcombine.low %v730_v10, %v730_v10 }
 0x119   : > { %v480_v21 = vpop.permute.xlu1 %479 }
 0x11a   : > { %v406_v15 = vsel %vm405_vm8, %v403_v12, %v404_v11  ;;  %989 = vmatprep.subr.msk.bf16.mxu0 %vm766_vm10, %v988_v13  ;;  %v768_v16 = vsel %vm766_vm10, %v987_v14, 0  ;;  %v482_v25 = vrot.slane %v480_v21, 4 }
 0x11b   : > { %v408_v17 = vsel %vm407_vm2, %v400_v9, %v406_v15  ;;  %784 = vmatpush1.bf16.msra.mxu0 %v768_v16  ;;  %v430_v18 = vpop.permute.xlu0 %429 }
 0x11c   : > { %410 = vst [vmem:[#allocation3 + $0x8] sm:$0x33] %v408_v17  ;;  %v433_v20 = vrot.slane %v430_v18, 4 }
 0x11d   : > { %v530_v32 = vpop.permute.xlu1 %529 }
 0x11e   : > { %v435_v22 = vsel %vm405_vm8, %v433_v20, %v434_v19  ;;  %v532_v36 = vrot.slane %v530_v32, 4 }
 0x11f   : > { %v437_v23 = vsel %vm436_vm11, %v430_v18, %v435_v22  ;;  %v478_v24 = vpop.permute.xlu0 %477 }
 0x120   : > { %439 = vst [vmem:[#allocation3 + $0x8] sm:$0xcc] %v437_v23  ;;  %v481_v26 = vrot.slane %v478_v24, 4 }
 0x122   : > { %v483_v27 = vsel %vm405_vm8, %v481_v26, %v482_v25 }
 0x123   : > { %v485_v28 = vsel %vm484_vm3, %v478_v24, %v483_v27  ;;  %v590_v29 = vpop.permute.xlu0 %589 }
 0x124   : > { %487 = vst [vmem:[#allocation3] sm:$0x33] %v485_v28  ;;  %v593_v31 = vrot.slane %v590_v29, 4 }
 0x126   : > { %v595_v33 = vsel %vm405_vm8, %v593_v31, %v594_v30 }
 0x127   : > { %v597_v34 = vsel %vm505_vm7, %v590_v29, %v595_v33  ;;  %v528_v35 = vpop.permute.xlu0 %527 }
 0x128   : > { %599 = vst [vmem:[#allocation3 + $0x20] sm:$0xcc] %v597_v34  ;;  %v531_v37 = vrot.slane %v528_v35, 4 }
 0x12a   : > { %v533_v38 = vsel %vm405_vm8, %v531_v37, %v532_v36 }
 0x12b   : > { %v535_v39 = vsel %vm534_vm5, %v528_v35, %v533_v38 }
 0x12c   : > { %537 = vst [vmem:[#allocation3] sm:$0xcc] %v535_v39 }
 0x12f   : > { %v1037_v40 = vld [vmem:[#allocation3 + $0x24] ss:$-16 sps:$4 sm:$0xff]   ;;  %v1039_v41 = vld [vmem:[#allocation3 + $0x20] ss:$-16 sps:$4 sm:$0xff]  }
 0x130   : > { %785 = vmatprep.subr.bf16.mxu0 %v1037_v40 }
 0x131   : > { %786 = vmatpush1.bf16.msra.mxu0 %v1039_v41 }
 0x133   : > { %v1040_v42 = vld [vmem:[#allocation3 + $0xc] ss:$-8 sps:$4 sm:$0xff]   ;;  %v1042_v43 = vld [vmem:[#allocation3 + $0x8] ss:$-8 sps:$4 sm:$0xff]  }
 0x134   : > { %787 = vmatprep.subr.bf16.mxu0 %v1040_v42  ;;  %v735_v45 = vpop.permute.xlu0 %734 }
 0x135   : > { %788 = vmatpush1.bf16.msra.mxu0 %v1042_v43 }
 0x138   : > { %990 = vmatmul.mubr.msk.bf16.vlgmr.msra.gmra.mxu0 %vm762_vm12, %v725_v44 }
 0x1f8   : > { %v807_v46 = vpop.f32.mrf.mxu0 }
 0x1f9   : > { %v808_v47 = vadd.f32 %v807_v46, %v735_v45 }
 0x1fa   : > { %v809_v48 = vpop.f32.mrf.mxu0 }
 0x1fb   : > { %v810_v49 = vadd.f32 %v809_v48, %v735_v45  ;;  %v818_v53 = vmul.f32 %v808_v47, %v808_v47 }
 0x1fc   : > { %v811_v50 = vpop.f32.mrf.mxu0 }
 0x1fd   : > { %v1013_v51 = vpack.c.bf16 %v810_v49, %v808_v47  ;;  %v814_v52 = vadd.f32 %v810_v49, %v808_v47  ;;  %v819_v54 = vmul.f32 %v810_v49, %v810_v49 }
 0x1fe   : > { %v812_v55 = vpop.f32.mrf.mxu0 }
 0x1ff   : > { %832 = vst [vmem:[%s318_s20] sm:$0xff] %v1013_v51  ;;  %815 = vadd.xlane.f32.xlu1 %v814_v52  ;;  %v820_v56 = vadd.f32 %v819_v54, %v818_v53 }
 0x201   : > { %821 = vadd.xlane.f32.xlu0 %v820_v56 }
 0x288   : > { %v816_v57 = vpop.xlane.xlu1 %815 }
 0x289   : > { %817 = vst.msk [vmem:[%s322_s23] sm:$0xff] %vm534_vm5, %v816_v57 }
 0x28a   : > { %v822_v58 = vpop.xlane.xlu0 %821 }
 0x28b   : > { %823 = vst.msk [vmem:[%s326_s26] sm:$0xff] %vm534_vm5, %v822_v58 }
 0x28c PF: > { %s19_s27 = sadd.s32 1, %s1049_s27  }
 0x28d   : > { %p16_p4 = scmp.ge.s32.totalorder %s19_s27, 4  }
 0x28f   :  { %18 = sbr.rel (!%p16_p4) target bundleno = 1 (0x1), region = 103 }

</bundles_post_ra>
